<compile_context>
chip_gen: v7x
topology: tpu7x:2x2x1
jax: 0.10.0
libtpu: 0.0.40
codegen_flags: <defaults>
</compile_context>

<pallas_src>
import functools

import jax
import jax.numpy as jnp
from jax.experimental import pallas as pl
from jax.experimental.pallas import tpu as pltpu

EPS = 1e-5
VMEM_LIMIT = 32 * 1024 * 1024  # conservative for v7x (64 MiB physical / 32 MiB scoped default)


def _compiler_params():
    return pltpu.CompilerParams(
        dimension_semantics=("parallel",),
        vmem_limit_bytes=VMEM_LIMIT,
    )


# ----------------------------------------------------------------------------
# Kernels
# ----------------------------------------------------------------------------
def make_conv3x3_kernel(stride):
    """3x3 conv (pre-padded input) as ONE K=9*Cin MXU matmul + per-sample BN partial stats.

    Inputs : xp_ref (1, Hp, Wp, Cin)  bf16  padded input, one batch element
             w_ref  (9*Cin, Cout)     bf16  weights folded in (dy, dx, cin) order
    Outputs: y_ref  (1, Ho*Wo, Cout)  bf16  raw conv output
             st_ref (1, 2, Cout)      f32   [sum, sum_of_squares] over Ho*Wo
    """

    def kernel(xp_ref, w_ref, y_ref, st_ref):
        xp = xp_ref[0]                                 # (Hp, Wp, Cin) bf16
        Hp, Wp, Cin = xp.shape
        Ho = (Hp - 3) // stride + 1
        Wo = (Wp - 3) // stride + 1

        # in-kernel im2col: 9 shifted taps concatenated along the contraction axis
        # TODO(synk): for stride=2 the strided slice materializes copies; a pre-reshaped
        # (Wo, 2) layout via the wrapper/BlockSpec would make the taps contiguous loads.
        taps = []
        for dy in range(3):
            for dx in range(3):
                p = jax.lax.slice(
                    xp,
                    (dy, dx, 0),
                    (dy + (Ho - 1) * stride + 1, dx + (Wo - 1) * stride + 1, Cin),
                    (stride, stride, 1),
                )                                      # (Ho, Wo, Cin)
                taps.append(p)
        patch = jnp.concatenate(taps, axis=-1)         # (Ho, Wo, 9*Cin)
        patch = patch.reshape(Ho * Wo, 9 * Cin)

        acc = jnp.dot(patch, w_ref[...],
                      preferred_element_type=jnp.float32)   # (Ho*Wo, Cout) f32

        # per-sample BatchNorm partial statistics (finalized in the wrapper)
        s = jnp.sum(acc, axis=0, keepdims=True)
        ss = jnp.sum(acc * acc, axis=0, keepdims=True)
        st_ref[0] = jnp.concatenate([s, ss], axis=0)   # (2, Cout)

        y_ref[0] = acc.astype(y_ref.dtype)

    return kernel


def make_conv1x1_kernel(stride):
    """1x1 strided conv for the downsample shortcut + per-sample BN partial stats."""

    def kernel(x_ref, w_ref, y_ref, st_ref):
        x = x_ref[0]                                   # (H, W, Cin) bf16
        H, W, Cin = x.shape
        xs = jax.lax.slice(x, (0, 0, 0), (H, W, Cin), (stride, stride, 1))
        Ho, Wo = xs.shape[0], xs.shape[1]
        acc = jnp.dot(xs.reshape(Ho * Wo, Cin), w_ref[...],
                      preferred_element_type=jnp.float32)
        s = jnp.sum(acc, axis=0, keepdims=True)
        ss = jnp.sum(acc * acc, axis=0, keepdims=True)
        st_ref[0] = jnp.concatenate([s, ss], axis=0)
        y_ref[0] = acc.astype(y_ref.dtype)

    return kernel


def make_bn_act_kernel(shortcut):
    """Fused BN scale/shift [+ residual] + grouped Rational, lane-dense (Ho, Wo*Cout) layout.

    shortcut: None    -> no residual (stage 1)
              "add"   -> identity residual
              "bn"    -> conv1x1 shortcut with its BN folded into sc_scale/sc_shift
    All per-channel coefficients are pre-tiled to width Wo*Cout in the wrapper.
    """

    def kernel(y_ref, scale_ref, shift_ref, num_ref, den_ref, *rest):
        if shortcut == "bn":
            sc_ref, sc_scale_ref, sc_shift_ref, o_ref = rest
        elif shortcut == "add":
            sc_ref, o_ref = rest
        else:
            (o_ref,) = rest

        y = y_ref[0].astype(jnp.float32)               # (Ho, WC)
        y = y * scale_ref[...] + shift_ref[...]        # BN as a single fused scale/shift pass

        if shortcut == "add":
            y = y + sc_ref[0].astype(jnp.float32)
        elif shortcut == "bn":
            y = y + sc_ref[0].astype(jnp.float32) * sc_scale_ref[...] + sc_shift_ref[...]

        # Rational activation, version 'A':
        #   P(x) = a0 + a1 x + ... + a5 x^5 ; Q(x) = 1 + |b0 x + b1 x^2 + b2 x^3 + b3 x^4|
        # Coefficient tables are loaded once; each row is a (1, WC) sublane-broadcast
        # (no per-iteration reshape/broadcast ops).
        a = num_ref[...]                               # (6, WC)
        b = den_ref[...]                               # (4, WC)
        p = a[5:6]
        for k in range(4, -1, -1):
            p = p * y + a[k:k + 1]
        q = b[3:4]
        for k in range(2, -1, -1):
            q = q * y + b[k:k + 1]
        q = 1.0 + jnp.abs(q * y)

        o_ref[0] = (p * pl.reciprocal(q, approx=True)).astype(o_ref.dtype)

    return kernel


# ----------------------------------------------------------------------------
# pallas_call wrappers
# ----------------------------------------------------------------------------
def conv3x3_call(xp, w_folded, stride):
    N, Hp, Wp, Cin = xp.shape
    Cout = w_folded.shape[-1]
    Ho = (Hp - 3) // stride + 1
    Wo = (Wp - 3) // stride + 1
    M = Ho * Wo
    flops = 2 * N * M * (9 * Cin) * Cout
    bytes_accessed = int(xp.size) * 2 + int(w_folded.size) * 2 + N * M * Cout * 2 + N * 2 * Cout * 4
    return pl.pallas_call(
        make_conv3x3_kernel(stride),
        grid=(N,),
        in_specs=[
            pl.BlockSpec((1, Hp, Wp, Cin), lambda n: (n, 0, 0, 0)),
            pl.BlockSpec((9 * Cin, Cout), lambda n: (0, 0)),
        ],
        out_specs=(
            pl.BlockSpec((1, M, Cout), lambda n: (n, 0, 0)),
            pl.BlockSpec((1, 2, Cout), lambda n: (n, 0, 0)),
        ),
        out_shape=(
            jax.ShapeDtypeStruct((N, M, Cout), jnp.bfloat16),
            jax.ShapeDtypeStruct((N, 2, Cout), jnp.float32),
        ),
        compiler_params=_compiler_params(),
        cost_estimate=pl.CostEstimate(flops=flops, transcendentals=0,
                                      bytes_accessed=bytes_accessed),
    )(xp, w_folded)


def conv1x1_call(x, w, stride):
    N, H, W, Cin = x.shape
    Cout = w.shape[-1]
    Ho = (H + stride - 1) // stride
    Wo = (W + stride - 1) // stride
    M = Ho * Wo
    flops = 2 * N * M * Cin * Cout
    bytes_accessed = int(x.size) * 2 + int(w.size) * 2 + N * M * Cout * 2 + N * 2 * Cout * 4
    return pl.pallas_call(
        make_conv1x1_kernel(stride),
        grid=(N,),
        in_specs=[
            pl.BlockSpec((1, H, W, Cin), lambda n: (n, 0, 0, 0)),
            pl.BlockSpec((Cin, Cout), lambda n: (0, 0)),
        ],
        out_specs=(
            pl.BlockSpec((1, M, Cout), lambda n: (n, 0, 0)),
            pl.BlockSpec((1, 2, Cout), lambda n: (n, 0, 0)),
        ),
        out_shape=(
            jax.ShapeDtypeStruct((N, M, Cout), jnp.bfloat16),
            jax.ShapeDtypeStruct((N, 2, Cout), jnp.float32),
        ),
        compiler_params=_compiler_params(),
        cost_estimate=pl.CostEstimate(flops=flops, transcendentals=0,
                                      bytes_accessed=bytes_accessed),
    )(x, w)


def bn_act_call(y, scale_t, shift_t, num_t, den_t, *, shortcut=None, sc=None,
                sc_scale_t=None, sc_shift_t=None, out_dtype=jnp.float32):
    N, Ho, WC = y.shape
    inputs = [y, scale_t, shift_t, num_t, den_t]
    in_specs = [
        pl.BlockSpec((1, Ho, WC), lambda n: (n, 0, 0)),
        pl.BlockSpec((1, WC), lambda n: (0, 0)),
        pl.BlockSpec((1, WC), lambda n: (0, 0)),
        pl.BlockSpec((6, WC), lambda n: (0, 0)),
        pl.BlockSpec((4, WC), lambda n: (0, 0)),
    ]
    if shortcut is not None:
        inputs.append(sc)
        in_specs.append(pl.BlockSpec((1, Ho, WC), lambda n: (n, 0, 0)))
        if shortcut == "bn":
            inputs += [sc_scale_t, sc_shift_t]
            in_specs += [pl.BlockSpec((1, WC), lambda n: (0, 0)),
                         pl.BlockSpec((1, WC), lambda n: (0, 0))]

    elems = N * Ho * WC
    bytes_accessed = sum(int(a.size) * a.dtype.itemsize for a in inputs)
    bytes_accessed += elems * jnp.dtype(out_dtype).itemsize
    return pl.pallas_call(
        make_bn_act_kernel(shortcut),
        grid=(N,),
        in_specs=in_specs,
        out_specs=pl.BlockSpec((1, Ho, WC), lambda n: (n, 0, 0)),
        out_shape=jax.ShapeDtypeStruct((N, Ho, WC), out_dtype),
        compiler_params=_compiler_params(),
        cost_estimate=pl.CostEstimate(flops=elems * 30, transcendentals=elems,
                                      bytes_accessed=bytes_accessed),
    )(*inputs)


# ----------------------------------------------------------------------------
# Tiny per-channel helpers (BN stats finalize + lane-dense coefficient tiling)
# ----------------------------------------------------------------------------
def _bn_scale_shift(stats, gamma, beta, count):
    # "Stats finalize": fold mean/var/gamma/beta into one scale/shift so the normalize
    # kernel is a single FMA pass.  E[x^2]-E[x]^2 in f32 (conv accumulates in f32); fine
    # at activation scale.  Matches PyTorch training-mode BN (biased variance, eps=1e-5);
    # running stats are not tracked.
    s = jnp.sum(stats, axis=0)                         # (2, C)
    mean = s[0] / count
    var = jnp.maximum(s[1] / count - mean * mean, 0.0)
    scale = gamma * jax.lax.rsqrt(var + EPS)
    shift = beta - mean * scale
    return scale, shift


def _lane_tile(v, reps):
    """Tile per-channel row(s) to the folded (…, Wo*Cout) lane-dense width."""
    if v.ndim == 1:
        return jnp.tile(v, reps)[None, :].astype(jnp.float32)     # (1, Wo*C)
    return jnp.tile(v, (1, reps)).astype(jnp.float32)             # (k, Wo*C)


# ----------------------------------------------------------------------------
# Parameter initialization (deterministic, synthetic)
# ----------------------------------------------------------------------------
def _rational_coeffs(key, num_rationals, split_size):
    num_base = jnp.array([0.0304, 0.6180, 2.3751, 3.0661, 1.5247, 0.2528], jnp.float32)
    den_base = jnp.array([1.1916, 4.4081, 0.9111, 0.3489], jnp.float32)
    k1, k2 = jax.random.split(key)
    num = num_base[None, :] + 0.02 * jax.random.normal(k1, (num_rationals, 6), jnp.float32)
    den = den_base[None, :] + 0.02 * jax.random.normal(k2, (num_rationals, 4), jnp.float32)
    # expand group coefficients to per-channel tables: (d, C)
    num_pc = jnp.repeat(num, split_size, axis=0).T
    den_pc = jnp.repeat(den, split_size, axis=0).T
    return num_pc, den_pc


def init_params(key, planes_in, planes_out, num_rationals=4, downsample=False):
    assert planes_out % num_rationals == 0
    split_size = planes_out // num_rationals
    ks = jax.random.split(key, 10)
    p = {
        "w1": 0.1 * jax.random.normal(ks[0], (3, 3, planes_in, planes_out), jnp.float32),
        "w2": 0.1 * jax.random.normal(ks[1], (3, 3, planes_out, planes_out), jnp.float32),
        "bn1_gamma": 1.0 + 0.1 * jax.random.normal(ks[2], (planes_out,), jnp.float32),
        "bn1_beta": 0.1 * jax.random.normal(ks[3], (planes_out,), jnp.float32),
        "bn2_gamma": 1.0 + 0.1 * jax.random.normal(ks[4], (planes_out,), jnp.float32),
        "bn2_beta": 0.1 * jax.random.normal(ks[5], (planes_out,), jnp.float32),
    }
    p["rat1_num"], p["rat1_den"] = _rational_coeffs(ks[6], num_rationals, split_size)
    p["rat2_num"], p["rat2_den"] = _rational_coeffs(ks[7], num_rationals, split_size)
    if downsample:
        p["w_sc"] = 0.1 * jax.random.normal(ks[8], (planes_in, planes_out), jnp.float32)
        p["bn_sc_gamma"] = 1.0 + 0.1 * jax.random.normal(ks[9], (planes_out,), jnp.float32)
        p["bn_sc_beta"] = jnp.zeros((planes_out,), jnp.float32)
    return p


# ----------------------------------------------------------------------------
# Forward (glue: transposes / pads / free reshapes; heavy compute in Pallas kernels)
# ----------------------------------------------------------------------------
@functools.partial(jax.jit, static_argnames=("stride", "downsample"))
def rational_basic_block_forward(x_nchw, params, *, stride=1, downsample=False):
    x = jnp.transpose(x_nchw, (0, 2, 3, 1)).astype(jnp.float32)   # NCHW -> NHWC
    N, H, W, Cin = x.shape
    Cout = params["w1"].shape[-1]
    Ho = (H + 2 - 3) // stride + 1
    Wo = (W + 2 - 3) // stride + 1
    WC = Wo * Cout
    count = float(N * Ho * Wo)

    if not downsample and (stride != 1 or Cin != Cout):
        raise ValueError("identity shortcut requires stride == 1 and planes_in == planes_out")

    x_bf = x.astype(jnp.bfloat16)                                  # bf16 activations in HBM
    w1 = params["w1"].reshape(9 * Cin, Cout).astype(jnp.bfloat16)  # (dy, dx, cin) folded
    w2 = params["w2"].reshape(9 * Cout, Cout).astype(jnp.bfloat16)

    # ---- stage 1: conv1 (+ partial stats) -> BN finalize -> Rational ----
    # TODO(synk): the inter-stage jnp.pad could be fused into the activation kernel's
    # out_spec (write into a pre-padded buffer) to save one HBM round trip.
    xp1 = jnp.pad(x_bf, ((0, 0), (1, 1), (1, 1), (0, 0)))
    y1_raw, st1 = conv3x3_call(xp1, w1, stride)
    scale1, shift1 = _bn_scale_shift(st1, params["bn1_gamma"], params["bn1_beta"], count)
    y1 = bn_act_call(
        y1_raw.reshape(N, Ho, WC),                                 # free fold -> lane-dense layout
        _lane_tile(scale1, Wo), _lane_tile(shift1, Wo),
        _lane_tile(params["rat1_num"], Wo), _lane_tile(params["rat1_den"], Wo),
        shortcut=None, out_dtype=jnp.bfloat16)

    # ---- shortcut branch ----
    if downsample:
        w_sc = params["w_sc"].astype(jnp.bfloat16)
        sc_raw, st_sc = conv1x1_call(x_bf, w_sc, stride)
        sc_scale, sc_shift = _bn_scale_shift(st_sc, params["bn_sc_gamma"],
                                             params["bn_sc_beta"], count)
        sc_kwargs = dict(shortcut="bn", sc=sc_raw.reshape(N, Ho, WC),
                         sc_scale_t=_lane_tile(sc_scale, Wo),
                         sc_shift_t=_lane_tile(sc_shift, Wo))
    else:
        sc_kwargs = dict(shortcut="add", sc=x_bf.reshape(N, H, W * Cin))

    # ---- stage 2: conv2 -> BN finalize -> (+shortcut) -> Rational ----
    xp2 = jnp.pad(y1.reshape(N, Ho, Wo, Cout), ((0, 0), (1, 1), (1, 1), (0, 0)))
    y2_raw, st2 = conv3x3_call(xp2, w2, 1)
    scale2, shift2 = _bn_scale_shift(st2, params["bn2_gamma"], params["bn2_beta"], count)
    out = bn_act_call(
        y2_raw.reshape(N, Ho, WC),
        _lane_tile(scale2, Wo), _lane_tile(shift2, Wo),
        _lane_tile(params["rat2_num"], Wo), _lane_tile(params["rat2_den"], Wo),
        out_dtype=jnp.float32, **sc_kwargs)

    return jnp.transpose(out.reshape(N, Ho, Wo, Cout), (0, 3, 1, 2))   # NHWC -> NCHW


# ----------------------------------------------------------------------------
if __name__ == "__main__":
    key = jax.random.PRNGKey(0)
    k_x, k_p = jax.random.split(key)

    # Small shapes consistent with the module: N=2, planes_in=planes_out=8, 16x16 spatial.
    # W * C = 16 * 8 = 128 -> the folded elementwise layout is exactly one full lane row.
    N, C, H, W = 2, 8, 16, 16
    x = jax.random.normal(k_x, (N, C, H, W), jnp.float32)          # NCHW, like PyTorch input

    params = init_params(k_p, planes_in=C, planes_out=C, num_rationals=4, downsample=False)

    out = rational_basic_block_forward(x, params, stride=1, downsample=False)
    out = jax.block_until_ready(out)

    assert out.shape == (N, C, H, W), out.shape
    assert bool(jnp.all(jnp.isfinite(out)))
    print("KERNEL_OK")
</pallas_src>

<mosaic_0001>
module attributes {stable_mosaic.version = 11 : i64} {
  func.func @kernel(%arg0: i32, %arg1: memref<1x16x128xbf16, #tpu.memory_space<vmem>>, %arg2: memref<1x128xf32, #tpu.memory_space<vmem>>, %arg3: memref<1x128xf32, #tpu.memory_space<vmem>>, %arg4: memref<6x128xf32, #tpu.memory_space<vmem>>, %arg5: memref<4x128xf32, #tpu.memory_space<vmem>>, %arg6: memref<1x16x128xbf16, #tpu.memory_space<vmem>>) attributes {dimension_semantics = [#tpu.dimension_semantics<parallel>], iteration_bounds = array<i64: 2>, scalar_prefetch = 0 : i64, scratch_operands = 0 : i64, tpu.core_type = #tpu.core_type<tc>, window_params = [{transform_indices = @transform_0, window_bounds = array<i64: 1, 16, 128>}, {pipeline_mode = #tpu.pipeline_mode<synchronous>, transform_indices = @transform_1, window_bounds = array<i64: 1, 128>}, {pipeline_mode = #tpu.pipeline_mode<synchronous>, transform_indices = @transform_2, window_bounds = array<i64: 1, 128>}, {pipeline_mode = #tpu.pipeline_mode<synchronous>, transform_indices = @transform_3, window_bounds = array<i64: 6, 128>}, {pipeline_mode = #tpu.pipeline_mode<synchronous>, transform_indices = @transform_4, window_bounds = array<i64: 4, 128>}, {transform_indices = @transform_5, window_bounds = array<i64: 1, 16, 128>}]} {
    %c0 = arith.constant 0 : index
    %c0_0 = arith.constant 0 : index
    %c0_1 = arith.constant 0 : index
    %0 = vector.load %arg1[%c0, %c0_0, %c0_1] : memref<1x16x128xbf16, #tpu.memory_space<vmem>>, vector<1x16x128xbf16>
    %1 = vector.shape_cast %0 : vector<1x16x128xbf16> to vector<16x128xbf16>
    %2 = arith.extf %1 : vector<16x128xbf16> to vector<16x128xf32>
    %c0_2 = arith.constant 0 : index
    %c0_3 = arith.constant 0 : index
    %3 = vector.load %arg2[%c0_2, %c0_3] : memref<1x128xf32, #tpu.memory_space<vmem>>, vector<1x128xf32>
    %4 = vector.broadcast %3 : vector<1x128xf32> to vector<16x128xf32>
    %5 = arith.mulf %2, %4 : vector<16x128xf32>
    %c0_4 = arith.constant 0 : index
    %c0_5 = arith.constant 0 : index
    %6 = vector.load %arg3[%c0_4, %c0_5] : memref<1x128xf32, #tpu.memory_space<vmem>>, vector<1x128xf32>
    %7 = vector.broadcast %6 : vector<1x128xf32> to vector<16x128xf32>
    %8 = arith.addf %5, %7 : vector<16x128xf32>
    %c0_6 = arith.constant 0 : index
    %c0_7 = arith.constant 0 : index
    %9 = vector.load %arg4[%c0_6, %c0_7] : memref<6x128xf32, #tpu.memory_space<vmem>>, vector<6x128xf32>
    %c0_8 = arith.constant 0 : index
    %c0_9 = arith.constant 0 : index
    %10 = vector.load %arg5[%c0_8, %c0_9] : memref<4x128xf32, #tpu.memory_space<vmem>>, vector<4x128xf32>
    %11 = vector.extract_strided_slice %9 {offsets = [5, 0], sizes = [1, 128], strides = [1, 1]} : vector<6x128xf32> to vector<1x128xf32>
    %12 = vector.broadcast %11 : vector<1x128xf32> to vector<16x128xf32>
    %13 = arith.mulf %12, %8 : vector<16x128xf32>
    %14 = vector.extract_strided_slice %9 {offsets = [4, 0], sizes = [1, 128], strides = [1, 1]} : vector<6x128xf32> to vector<1x128xf32>
    %15 = vector.broadcast %14 : vector<1x128xf32> to vector<16x128xf32>
    %16 = arith.addf %13, %15 : vector<16x128xf32>
    %17 = arith.mulf %16, %8 : vector<16x128xf32>
    %18 = vector.extract_strided_slice %9 {offsets = [3, 0], sizes = [1, 128], strides = [1, 1]} : vector<6x128xf32> to vector<1x128xf32>
    %19 = vector.broadcast %18 : vector<1x128xf32> to vector<16x128xf32>
    %20 = arith.addf %17, %19 : vector<16x128xf32>
    %21 = arith.mulf %20, %8 : vector<16x128xf32>
    %22 = vector.extract_strided_slice %9 {offsets = [2, 0], sizes = [1, 128], strides = [1, 1]} : vector<6x128xf32> to vector<1x128xf32>
    %23 = vector.broadcast %22 : vector<1x128xf32> to vector<16x128xf32>
    %24 = arith.addf %21, %23 : vector<16x128xf32>
    %25 = arith.mulf %24, %8 : vector<16x128xf32>
    %26 = vector.extract_strided_slice %9 {offsets = [1, 0], sizes = [1, 128], strides = [1, 1]} : vector<6x128xf32> to vector<1x128xf32>
    %27 = vector.broadcast %26 : vector<1x128xf32> to vector<16x128xf32>
    %28 = arith.addf %25, %27 : vector<16x128xf32>
    %29 = arith.mulf %28, %8 : vector<16x128xf32>
    %30 = vector.extract_strided_slice %9 {offsets = [0, 0], sizes = [1, 128], strides = [1, 1]} : vector<6x128xf32> to vector<1x128xf32>
    %31 = vector.broadcast %30 : vector<1x128xf32> to vector<16x128xf32>
    %32 = arith.addf %29, %31 : vector<16x128xf32>
    %33 = vector.extract_strided_slice %10 {offsets = [3, 0], sizes = [1, 128], strides = [1, 1]} : vector<4x128xf32> to vector<1x128xf32>
    %34 = vector.broadcast %33 : vector<1x128xf32> to vector<16x128xf32>
    %35 = arith.mulf %34, %8 : vector<16x128xf32>
    %36 = vector.extract_strided_slice %10 {offsets = [2, 0], sizes = [1, 128], strides = [1, 1]} : vector<4x128xf32> to vector<1x128xf32>
    %37 = vector.broadcast %36 : vector<1x128xf32> to vector<16x128xf32>
    %38 = arith.addf %35, %37 : vector<16x128xf32>
    %39 = arith.mulf %38, %8 : vector<16x128xf32>
    %40 = vector.extract_strided_slice %10 {offsets = [1, 0], sizes = [1, 128], strides = [1, 1]} : vector<4x128xf32> to vector<1x128xf32>
    %41 = vector.broadcast %40 : vector<1x128xf32> to vector<16x128xf32>
    %42 = arith.addf %39, %41 : vector<16x128xf32>
    %43 = arith.mulf %42, %8 : vector<16x128xf32>
    %44 = vector.extract_strided_slice %10 {offsets = [0, 0], sizes = [1, 128], strides = [1, 1]} : vector<4x128xf32> to vector<1x128xf32>
    %45 = vector.broadcast %44 : vector<1x128xf32> to vector<16x128xf32>
    %46 = arith.addf %43, %45 : vector<16x128xf32>
    %47 = arith.mulf %46, %8 : vector<16x128xf32>
    %48 = math.absf %47 : vector<16x128xf32>
    %cst = arith.constant 1.000000e+00 : f32
    %49 = vector.broadcast %cst : f32 to vector<16x128xf32>
    %50 = arith.addf %49, %48 : vector<16x128xf32>
    %51 = tpu.reciprocal %50 {approx = true} : vector<16x128xf32> -> vector<16x128xf32>
    %52 = arith.mulf %32, %51 : vector<16x128xf32>
    %53 = arith.truncf %52 : vector<16x128xf32> to vector<16x128xbf16>
    %c0_10 = arith.constant 0 : index
    %c0_11 = arith.constant 0 : index
    %c0_12 = arith.constant 0 : index
    %54 = vector.load %arg6[%c0_10, %c0_11, %c0_12] : memref<1x16x128xbf16, #tpu.memory_space<vmem>>, vector<1x16x128xbf16>
    %55 = vector.shape_cast %54 : vector<1x16x128xbf16> to vector<16x128xbf16>
    %56 = vector.shape_cast %53 : vector<16x128xbf16> to vector<1x16x128xbf16>
    tpu.vector_store %arg6[%c0_10, %c0_11, %c0_12], %56 {strides = array<i32>} : memref<1x16x128xbf16, #tpu.memory_space<vmem>>, vector<1x16x128xbf16>,
    return
  }
  func.func @transform_0(%arg0: i32) -> (i32, i32, i32) {
    %c0_i32 = arith.constant 0 : i32
    %c0_i32_0 = arith.constant 0 : i32
    %c0_i32_1 = arith.constant 0 : i32
    return %arg0, %c0_i32, %c0_i32_0 : i32, i32, i32
  }
  func.func @transform_1(%arg0: i32) -> (i32, i32) {
    %c0_i32 = arith.constant 0 : i32
    %c0_i32_0 = arith.constant 0 : i32
    %c0_i32_1 = arith.constant 0 : i32
    return %c0_i32, %c0_i32_0 : i32, i32
  }
  func.func @transform_2(%arg0: i32) -> (i32, i32) {
    %c0_i32 = arith.constant 0 : i32
    %c0_i32_0 = arith.constant 0 : i32
    %c0_i32_1 = arith.constant 0 : i32
    return %c0_i32, %c0_i32_0 : i32, i32
  }
  func.func @transform_3(%arg0: i32) -> (i32, i32) {
    %c0_i32 = arith.constant 0 : i32
    %c0_i32_0 = arith.constant 0 : i32
    %c0_i32_1 = arith.constant 0 : i32
    return %c0_i32, %c0_i32_0 : i32, i32
  }
  func.func @transform_4(%arg0: i32) -> (i32, i32) {
    %c0_i32 = arith.constant 0 : i32
    %c0_i32_0 = arith.constant 0 : i32
    %c0_i32_1 = arith.constant 0 : i32
    return %c0_i32, %c0_i32_0 : i32, i32
  }
  func.func @transform_5(%arg0: i32) -> (i32, i32, i32) {
    %c0_i32 = arith.constant 0 : i32
    %c0_i32_0 = arith.constant 0 : i32
    %c0_i32_1 = arith.constant 0 : i32
    return %arg0, %c0_i32, %c0_i32_0 : i32, i32, i32
  }
}

module attributes {stable_mosaic.version = 11 : i64} {
  func.func @kernel(%arg0: i32, %arg1: memref<1x18x18x8xbf16, #tpu.memory_space<vmem>>, %arg2: memref<72x8xbf16, #tpu.memory_space<vmem>>, %arg3: memref<1x256x8xbf16, #tpu.memory_space<vmem>>, %arg4: memref<1x2x8xf32, #tpu.memory_space<vmem>>) attributes {dimension_semantics = [#tpu.dimension_semantics<parallel>], iteration_bounds = array<i64: 2>, scalar_prefetch = 0 : i64, scratch_operands = 0 : i64, tpu.core_type = #tpu.core_type<tc>, window_params = [{transform_indices = @transform_0, window_bounds = array<i64: 1, 18, 18, 8>}, {pipeline_mode = #tpu.pipeline_mode<synchronous>, transform_indices = @transform_1, window_bounds = array<i64: 72, 8>}, {transform_indices = @transform_2, window_bounds = array<i64: 1, 256, 8>}, {transform_indices = @transform_3, window_bounds = array<i64: 1, 2, 8>}]} {
    %c0 = arith.constant 0 : index
    %c0_0 = arith.constant 0 : index
    %c0_1 = arith.constant 0 : index
    %c0_2 = arith.constant 0 : index
    %0 = vector.load %arg1[%c0, %c0_0, %c0_1, %c0_2] : memref<1x18x18x8xbf16, #tpu.memory_space<vmem>>, vector<1x18x18x8xbf16>
    %1 = vector.shape_cast %0 : vector<1x18x18x8xbf16> to vector<18x18x8xbf16>
    %2 = vector.extract_strided_slice %1 {offsets = [0, 0, 0], sizes = [16, 16, 8], strides = [1, 1, 1]} : vector<18x18x8xbf16> to vector<16x16x8xbf16>
    %3 = vector.extract_strided_slice %1 {offsets = [0, 1, 0], sizes = [16, 16, 8], strides = [1, 1, 1]} : vector<18x18x8xbf16> to vector<16x16x8xbf16>
    %4 = vector.extract_strided_slice %1 {offsets = [0, 2, 0], sizes = [16, 16, 8], strides = [1, 1, 1]} : vector<18x18x8xbf16> to vector<16x16x8xbf16>
    %5 = vector.extract_strided_slice %1 {offsets = [1, 0, 0], sizes = [16, 16, 8], strides = [1, 1, 1]} : vector<18x18x8xbf16> to vector<16x16x8xbf16>
    %6 = vector.extract_strided_slice %1 {offsets = [1, 1, 0], sizes = [16, 16, 8], strides = [1, 1, 1]} : vector<18x18x8xbf16> to vector<16x16x8xbf16>
    %7 = vector.extract_strided_slice %1 {offsets = [1, 2, 0], sizes = [16, 16, 8], strides = [1, 1, 1]} : vector<18x18x8xbf16> to vector<16x16x8xbf16>
    %8 = vector.extract_strided_slice %1 {offsets = [2, 0, 0], sizes = [16, 16, 8], strides = [1, 1, 1]} : vector<18x18x8xbf16> to vector<16x16x8xbf16>
    %9 = vector.extract_strided_slice %1 {offsets = [2, 1, 0], sizes = [16, 16, 8], strides = [1, 1, 1]} : vector<18x18x8xbf16> to vector<16x16x8xbf16>
    %10 = vector.extract_strided_slice %1 {offsets = [2, 2, 0], sizes = [16, 16, 8], strides = [1, 1, 1]} : vector<18x18x8xbf16> to vector<16x16x8xbf16>
    %11 = tpu.concatenate %2, %3, %4, %5, %6, %7, %8, %9, %10 in 2 : vector<16x16x8xbf16>, vector<16x16x8xbf16>, vector<16x16x8xbf16>, vector<16x16x8xbf16>, vector<16x16x8xbf16>, vector<16x16x8xbf16>, vector<16x16x8xbf16>, vector<16x16x8xbf16>, vector<16x16x8xbf16> -> vector<16x16x72xbf16>
    %12 = vector.shape_cast %11 : vector<16x16x72xbf16> to vector<256x72xbf16>
    %c0_3 = arith.constant 0 : index
    %c0_4 = arith.constant 0 : index
    %13 = vector.load %arg2[%c0_3, %c0_4] : memref<72x8xbf16, #tpu.memory_space<vmem>>, vector<72x8xbf16>
    %cst = arith.constant dense<0.000000e+00> : vector<256x8xf32>
    %14 = tpu.matmul %12, %13, %cst {dimension_numbers = #tpu.dot_dimension_numbers<[1], [0], [0], [1], [0, 0, 1, 1], [], []>} : vector<256x72xbf16>, vector<72x8xbf16>, vector<256x8xf32> -> vector<256x8xf32>
    %cst_5 = arith.constant dense<0.000000e+00> : vector<8xf32>
    %15 = vector.multi_reduction <add>, %14, %cst_5 [0] : vector<256x8xf32> to vector<8xf32>
    %16 = vector.shape_cast %15 : vector<8xf32> to vector<1x8xf32>
    %17 = arith.mulf %14, %14 : vector<256x8xf32>
    %cst_6 = arith.constant dense<0.000000e+00> : vector<8xf32>
    %18 = vector.multi_reduction <add>, %17, %cst_6 [0] : vector<256x8xf32> to vector<8xf32>
    %19 = vector.shape_cast %18 : vector<8xf32> to vector<1x8xf32>
    %20 = tpu.concatenate %16, %19 in 0 : vector<1x8xf32>, vector<1x8xf32> -> vector<2x8xf32>
    %c0_7 = arith.constant 0 : index
    %c0_8 = arith.constant 0 : index
    %c0_9 = arith.constant 0 : index
    %21 = vector.load %arg4[%c0_7, %c0_8, %c0_9] : memref<1x2x8xf32, #tpu.memory_space<vmem>>, vector<1x2x8xf32>
    %22 = vector.shape_cast %21 : vector<1x2x8xf32> to vector<2x8xf32>
    %23 = vector.shape_cast %20 : vector<2x8xf32> to vector<1x2x8xf32>
    tpu.vector_store %arg4[%c0_7, %c0_8, %c0_9], %23 {strides = array<i32>} : memref<1x2x8xf32, #tpu.memory_space<vmem>>, vector<1x2x8xf32>,
    %24 = arith.truncf %14 : vector<256x8xf32> to vector<256x8xbf16>
    %c0_10 = arith.constant 0 : index
    %c0_11 = arith.constant 0 : index
    %c0_12 = arith.constant 0 : index
    %25 = vector.load %arg3[%c0_10, %c0_11, %c0_12] : memref<1x256x8xbf16, #tpu.memory_space<vmem>>, vector<1x256x8xbf16>
    %26 = vector.shape_cast %25 : vector<1x256x8xbf16> to vector<256x8xbf16>
    %27 = vector.shape_cast %24 : vector<256x8xbf16> to vector<1x256x8xbf16>
    tpu.vector_store %arg3[%c0_10, %c0_11, %c0_12], %27 {strides = array<i32>} : memref<1x256x8xbf16, #tpu.memory_space<vmem>>, vector<1x256x8xbf16>,
    return
  }
  func.func @transform_0(%arg0: i32) -> (i32, i32, i32, i32) {
    %c0_i32 = arith.constant 0 : i32
    %c0_i32_0 = arith.constant 0 : i32
    %c0_i32_1 = arith.constant 0 : i32
    %c0_i32_2 = arith.constant 0 : i32
    return %arg0, %c0_i32, %c0_i32_0, %c0_i32_1 : i32, i32, i32, i32
  }
  func.func @transform_1(%arg0: i32) -> (i32, i32) {
    %c0_i32 = arith.constant 0 : i32
    %c0_i32_0 = arith.constant 0 : i32
    %c0_i32_1 = arith.constant 0 : i32
    return %c0_i32, %c0_i32_0 : i32, i32
  }
  func.func @transform_2(%arg0: i32) -> (i32, i32, i32) {
    %c0_i32 = arith.constant 0 : i32
    %c0_i32_0 = arith.constant 0 : i32
    %c0_i32_1 = arith.constant 0 : i32
    return %arg0, %c0_i32, %c0_i32_0 : i32, i32, i32
  }
  func.func @transform_3(%arg0: i32) -> (i32, i32, i32) {
    %c0_i32 = arith.constant 0 : i32
    %c0_i32_0 = arith.constant 0 : i32
    %c0_i32_1 = arith.constant 0 : i32
    return %arg0, %c0_i32, %c0_i32_0 : i32, i32, i32
  }
}

module attributes {stable_mosaic.version = 11 : i64} {
  func.func @kernel(%arg0: i32, %arg1: memref<1x16x128xbf16, #tpu.memory_space<vmem>>, %arg2: memref<1x128xf32, #tpu.memory_space<vmem>>, %arg3: memref<1x128xf32, #tpu.memory_space<vmem>>, %arg4: memref<6x128xf32, #tpu.memory_space<vmem>>, %arg5: memref<4x128xf32, #tpu.memory_space<vmem>>, %arg6: memref<1x16x128xbf16, #tpu.memory_space<vmem>>, %arg7: memref<1x16x128xf32, #tpu.memory_space<vmem>>) attributes {dimension_semantics = [#tpu.dimension_semantics<parallel>], iteration_bounds = array<i64: 2>, scalar_prefetch = 0 : i64, scratch_operands = 0 : i64, tpu.core_type = #tpu.core_type<tc>, window_params = [{transform_indices = @transform_0, window_bounds = array<i64: 1, 16, 128>}, {pipeline_mode = #tpu.pipeline_mode<synchronous>, transform_indices = @transform_1, window_bounds = array<i64: 1, 128>}, {pipeline_mode = #tpu.pipeline_mode<synchronous>, transform_indices = @transform_2, window_bounds = array<i64: 1, 128>}, {pipeline_mode = #tpu.pipeline_mode<synchronous>, transform_indices = @transform_3, window_bounds = array<i64: 6, 128>}, {pipeline_mode = #tpu.pipeline_mode<synchronous>, transform_indices = @transform_4, window_bounds = array<i64: 4, 128>}, {transform_indices = @transform_5, window_bounds = array<i64: 1, 16, 128>}, {transform_indices = @transform_6, window_bounds = array<i64: 1, 16, 128>}]} {
    %c0 = arith.constant 0 : index
    %c0_0 = arith.constant 0 : index
    %c0_1 = arith.constant 0 : index
    %0 = vector.load %arg1[%c0, %c0_0, %c0_1] : memref<1x16x128xbf16, #tpu.memory_space<vmem>>, vector<1x16x128xbf16>
    %1 = vector.shape_cast %0 : vector<1x16x128xbf16> to vector<16x128xbf16>
    %2 = arith.extf %1 : vector<16x128xbf16> to vector<16x128xf32>
    %c0_2 = arith.constant 0 : index
    %c0_3 = arith.constant 0 : index
    %3 = vector.load %arg2[%c0_2, %c0_3] : memref<1x128xf32, #tpu.memory_space<vmem>>, vector<1x128xf32>
    %4 = vector.broadcast %3 : vector<1x128xf32> to vector<16x128xf32>
    %5 = arith.mulf %2, %4 : vector<16x128xf32>
    %c0_4 = arith.constant 0 : index
    %c0_5 = arith.constant 0 : index
    %6 = vector.load %arg3[%c0_4, %c0_5] : memref<1x128xf32, #tpu.memory_space<vmem>>, vector<1x128xf32>
    %7 = vector.broadcast %6 : vector<1x128xf32> to vector<16x128xf32>
    %8 = arith.addf %5, %7 : vector<16x128xf32>
    %c0_6 = arith.constant 0 : index
    %c0_7 = arith.constant 0 : index
    %c0_8 = arith.constant 0 : index
    %9 = vector.load %arg6[%c0_6, %c0_7, %c0_8] : memref<1x16x128xbf16, #tpu.memory_space<vmem>>, vector<1x16x128xbf16>
    %10 = vector.shape_cast %9 : vector<1x16x128xbf16> to vector<16x128xbf16>
    %11 = arith.extf %10 : vector<16x128xbf16> to vector<16x128xf32>
    %12 = arith.addf %8, %11 : vector<16x128xf32>
    %c0_9 = arith.constant 0 : index
    %c0_10 = arith.constant 0 : index
    %13 = vector.load %arg4[%c0_9, %c0_10] : memref<6x128xf32, #tpu.memory_space<vmem>>, vector<6x128xf32>
    %c0_11 = arith.constant 0 : index
    %c0_12 = arith.constant 0 : index
    %14 = vector.load %arg5[%c0_11, %c0_12] : memref<4x128xf32, #tpu.memory_space<vmem>>, vector<4x128xf32>
    %15 = vector.extract_strided_slice %13 {offsets = [5, 0], sizes = [1, 128], strides = [1, 1]} : vector<6x128xf32> to vector<1x128xf32>
    %16 = vector.broadcast %15 : vector<1x128xf32> to vector<16x128xf32>
    %17 = arith.mulf %16, %12 : vector<16x128xf32>
    %18 = vector.extract_strided_slice %13 {offsets = [4, 0], sizes = [1, 128], strides = [1, 1]} : vector<6x128xf32> to vector<1x128xf32>
    %19 = vector.broadcast %18 : vector<1x128xf32> to vector<16x128xf32>
    %20 = arith.addf %17, %19 : vector<16x128xf32>
    %21 = arith.mulf %20, %12 : vector<16x128xf32>
    %22 = vector.extract_strided_slice %13 {offsets = [3, 0], sizes = [1, 128], strides = [1, 1]} : vector<6x128xf32> to vector<1x128xf32>
    %23 = vector.broadcast %22 : vector<1x128xf32> to vector<16x128xf32>
    %24 = arith.addf %21, %23 : vector<16x128xf32>
    %25 = arith.mulf %24, %12 : vector<16x128xf32>
    %26 = vector.extract_strided_slice %13 {offsets = [2, 0], sizes = [1, 128], strides = [1, 1]} : vector<6x128xf32> to vector<1x128xf32>
    %27 = vector.broadcast %26 : vector<1x128xf32> to vector<16x128xf32>
    %28 = arith.addf %25, %27 : vector<16x128xf32>
    %29 = arith.mulf %28, %12 : vector<16x128xf32>
    %30 = vector.extract_strided_slice %13 {offsets = [1, 0], sizes = [1, 128], strides = [1, 1]} : vector<6x128xf32> to vector<1x128xf32>
    %31 = vector.broadcast %30 : vector<1x128xf32> to vector<16x128xf32>
    %32 = arith.addf %29, %31 : vector<16x128xf32>
    %33 = arith.mulf %32, %12 : vector<16x128xf32>
    %34 = vector.extract_strided_slice %13 {offsets = [0, 0], sizes = [1, 128], strides = [1, 1]} : vector<6x128xf32> to vector<1x128xf32>
    %35 = vector.broadcast %34 : vector<1x128xf32> to vector<16x128xf32>
    %36 = arith.addf %33, %35 : vector<16x128xf32>
    %37 = vector.extract_strided_slice %14 {offsets = [3, 0], sizes = [1, 128], strides = [1, 1]} : vector<4x128xf32> to vector<1x128xf32>
    %38 = vector.broadcast %37 : vector<1x128xf32> to vector<16x128xf32>
    %39 = arith.mulf %38, %12 : vector<16x128xf32>
    %40 = vector.extract_strided_slice %14 {offsets = [2, 0], sizes = [1, 128], strides = [1, 1]} : vector<4x128xf32> to vector<1x128xf32>
    %41 = vector.broadcast %40 : vector<1x128xf32> to vector<16x128xf32>
    %42 = arith.addf %39, %41 : vector<16x128xf32>
    %43 = arith.mulf %42, %12 : vector<16x128xf32>
    %44 = vector.extract_strided_slice %14 {offsets = [1, 0], sizes = [1, 128], strides = [1, 1]} : vector<4x128xf32> to vector<1x128xf32>
    %45 = vector.broadcast %44 : vector<1x128xf32> to vector<16x128xf32>
    %46 = arith.addf %43, %45 : vector<16x128xf32>
    %47 = arith.mulf %46, %12 : vector<16x128xf32>
    %48 = vector.extract_strided_slice %14 {offsets = [0, 0], sizes = [1, 128], strides = [1, 1]} : vector<4x128xf32> to vector<1x128xf32>
    %49 = vector.broadcast %48 : vector<1x128xf32> to vector<16x128xf32>
    %50 = arith.addf %47, %49 : vector<16x128xf32>
    %51 = arith.mulf %50, %12 : vector<16x128xf32>
    %52 = math.absf %51 : vector<16x128xf32>
    %cst = arith.constant 1.000000e+00 : f32
    %53 = vector.broadcast %cst : f32 to vector<16x128xf32>
    %54 = arith.addf %53, %52 : vector<16x128xf32>
    %55 = tpu.reciprocal %54 {approx = true} : vector<16x128xf32> -> vector<16x128xf32>
    %56 = arith.mulf %36, %55 : vector<16x128xf32>
    %c0_13 = arith.constant 0 : index
    %c0_14 = arith.constant 0 : index
    %c0_15 = arith.constant 0 : index
    %57 = vector.load %arg7[%c0_13, %c0_14, %c0_15] : memref<1x16x128xf32, #tpu.memory_space<vmem>>, vector<1x16x128xf32>
    %58 = vector.shape_cast %57 : vector<1x16x128xf32> to vector<16x128xf32>
    %59 = vector.shape_cast %56 : vector<16x128xf32> to vector<1x16x128xf32>
    tpu.vector_store %arg7[%c0_13, %c0_14, %c0_15], %59 {strides = array<i32>} : memref<1x16x128xf32, #tpu.memory_space<vmem>>, vector<1x16x128xf32>,
    return
  }
  func.func @transform_0(%arg0: i32) -> (i32, i32, i32) {
    %c0_i32 = arith.constant 0 : i32
    %c0_i32_0 = arith.constant 0 : i32
    %c0_i32_1 = arith.constant 0 : i32
    return %arg0, %c0_i32, %c0_i32_0 : i32, i32, i32
  }
  func.func @transform_1(%arg0: i32) -> (i32, i32) {
    %c0_i32 = arith.constant 0 : i32
    %c0_i32_0 = arith.constant 0 : i32
    %c0_i32_1 = arith.constant 0 : i32
    return %c0_i32, %c0_i32_0 : i32, i32
  }
  func.func @transform_2(%arg0: i32) -> (i32, i32) {
    %c0_i32 = arith.constant 0 : i32
    %c0_i32_0 = arith.constant 0 : i32
    %c0_i32_1 = arith.constant 0 : i32
    return %c0_i32, %c0_i32_0 : i32, i32
  }
  func.func @transform_3(%arg0: i32) -> (i32, i32) {
    %c0_i32 = arith.constant 0 : i32
    %c0_i32_0 = arith.constant 0 : i32
    %c0_i32_1 = arith.constant 0 : i32
    return %c0_i32, %c0_i32_0 : i32, i32
  }
  func.func @transform_4(%arg0: i32) -> (i32, i32) {
    %c0_i32 = arith.constant 0 : i32
    %c0_i32_0 = arith.constant 0 : i32
    %c0_i32_1 = arith.constant 0 : i32
    return %c0_i32, %c0_i32_0 : i32, i32
  }
  func.func @transform_5(%arg0: i32) -> (i32, i32, i32) {
    %c0_i32 = arith.constant 0 : i32
    %c0_i32_0 = arith.constant 0 : i32
    %c0_i32_1 = arith.constant 0 : i32
    return %arg0, %c0_i32, %c0_i32_0 : i32, i32, i32
  }
  func.func @transform_6(%arg0: i32) -> (i32, i32, i32) {
    %c0_i32 = arith.constant 0 : i32
    %c0_i32_0 = arith.constant 0 : i32
    %c0_i32_1 = arith.constant 0 : i32
    return %arg0, %c0_i32, %c0_i32_0 : i32, i32, i32
  }
}

</mosaic_0001>

<bundles_post_ra>
// kernel: tile.43
= control target key start
LH: loop header
LB: loop body
LE: loop exit
PB: predicated region body
PF: predicated region fallthrough
CT: control target
= control target key end

     0   :  { %s28_s0 = inlined_call_operand.vmem [shape: f32[8], index: 0, kind: input, shape index: {}]   ;;  %s29_s1 = inlined_call_operand.vmem [shape: f32[16,8], index: 1, kind: output, shape index: {}]  }
   0x1   :  { %v4_v0 = vld [vmem:[%s28_s0] ss:$0 sm:$0xff] }
   0x2   :  { %5 = vst [vmem:[%s29_s1] sm:$0xff] %v4_v0  ;;  %8 = vst [vmem:[%s29_s1 + $0x8] sm:$0xff] %v4_v0 }

// kernel: tile.44
= control target key start
LH: loop header
LB: loop body
LE: loop exit
PB: predicated region body
PF: predicated region fallthrough
CT: control target
= control target key end

     0   :  { %s131_s10 = smov 120   ;;  %s132_s11 = smov 104   ;;  %vm3_vm0 = vcmask 64512   ;;  %vm9_vm1 = vcmask 1048512   ;;  %vm15_vm2 = vcmask 982912   ;;  %vm21_vm3 = vcmask 917312   ;;  %s207_s0 = inlined_call_operand.vmem [shape: f32[16,8], index: 0, kind: input, shape index: {}]   ;;  %s208_s1 = inlined_call_operand.vmem [shape: f32[1,128], index: 1, kind: output, shape index: {}]  }
   0x1   :  { %v101_v0 = vld [vmem:[%s207_s0 + $0xf] sm:$0x1]   ;;  %v103_v1 = vld [vmem:[%s207_s0 + $0xd] sm:$0x1]   ;;  %v102_v2 = vld [vmem:[%s207_s0 + $0xe] sm:$0x1]  }
   0x2   :  { %7 = vrot.lane.b32.xlu0 %v101_v0, %s131_s10  ;;  %19 = vrot.lane.b32.xlu1 %v103_v1, %s132_s11  ;;  %v104_v3 = vld [vmem:[%s207_s0 + $0xc] sm:$0x1]   ;;  %s133_s16 = smov 112   ;;  %s134_s17 = smov 96   ;;  %v105_v4 = vld [vmem:[%s207_s0 + $0xb] sm:$0x1]  }
   0x3   :  { %v106_v5 = vld [vmem:[%s207_s0 + $0xa] sm:$0x1]   ;;  %v2_v6 = vld [vmem:[%s207_s0] sm:$0x1]   ;;  %s135_s24 = smov 88   ;;  %s136_s25 = smov 80  }
   0x4   :  { %4 = vst.msk [vmem:[#allocation0] sm:$0x1] %vm3_vm0, %v2_v6   ;;  %v107_v7 = vld [vmem:[%s207_s0 + $0x9] sm:$0x1]   ;;  %v108_v8 = vld [vmem:[%s207_s0 + $0x8] sm:$0x1]  }
   0x5   :  { %s137_s30 = smov 72   ;;  %s138_s2 = smov 64   ;;  %v109_v9 = vld [vmem:[%s207_s0 + $0x7] sm:$0x1]   ;;  %v110_v10 = vld [vmem:[%s207_s0 + $0x6] sm:$0x1]  }
   0x6   :  { %13 = vrot.lane.b32.xlu0 %v102_v2, %s133_s16  ;;  %25 = vrot.lane.b32.xlu1 %v104_v3, %s134_s17  ;;  %s139_s7 = smov 56   ;;  %s140_s8 = smov 48   ;;  %v111_v11 = vld [vmem:[%s207_s0 + $0x5] sm:$0x1]   ;;  %v112_v12 = vld [vmem:[%s207_s0 + $0x4] sm:$0x1]  }
   0x7   :  { %s141_s13 = smov 40   ;;  %s142_s14 = smov 32   ;;  %v113_v13 = vld [vmem:[%s207_s0 + $0x3] sm:$0x1]   ;;  %v114_v14 = vld [vmem:[%s207_s0 + $0x2] sm:$0x1]  }
   0x8   :  { %s143_s19 = smov 24   ;;  %s144_s20 = smov 16   ;;  %v115_v15 = vld [vmem:[%s207_s0 + $0x1] sm:$0x1]   ;;  %vm27_vm4 = vcmask 851712   ;;  %vm33_vm5 = vcmask 786112  }
   0x9   :  { %s145_s0 = smov 8   ;;  %vm39_vm6 = vcmask 720512   ;;  %vm45_vm7 = vcmask 654912   ;;  %vm51_vm8 = vcmask 589312   ;;  %vm57_vm9 = vcmask 523712  }
   0xa   :  { %31 = vrot.lane.b32.xlu0 %v105_v4, %s135_s24  ;;  %37 = vrot.lane.b32.xlu1 %v106_v5, %s136_s25  ;;  %vm63_vm10 = vcmask 458112   ;;  %vm69_vm11 = vcmask 392512   ;;  %vm75_vm12 = vcmask 326912   ;;  %vm81_vm13 = vcmask 261312  }
   0xb   :  { %vm87_vm14 = vcmask 195712   ;;  %vm93_vm15 = vcmask 130112  }
   0xe   :  { %43 = vrot.lane.b32.xlu0 %v107_v7, %s137_s30  ;;  %49 = vrot.lane.b32.xlu1 %v108_v8, %s138_s2 }
  0x12   :  { %55 = vrot.lane.b32.xlu0 %v109_v9, %s139_s7  ;;  %61 = vrot.lane.b32.xlu1 %v110_v10, %s140_s8 }
  0x16   :  { %67 = vrot.lane.b32.xlu0 %v111_v11, %s141_s13  ;;  %73 = vrot.lane.b32.xlu1 %v112_v12, %s142_s14 }
  0x1a   :  { %79 = vrot.lane.b32.xlu0 %v113_v13, %s143_s19  ;;  %85 = vrot.lane.b32.xlu1 %v114_v14, %s144_s20 }
  0x1e   :  { %91 = vrot.lane.b32.xlu0 %v115_v15, %s145_s0 }
  0x74   :  { %v8_v16 = vpop.permute.xlu0 %7   ;;  %v20_v17 = vpop.permute.xlu1 %19  }
  0x75   :  { %10 = vst.msk [vmem:[#allocation0] sm:$0x1] %vm9_vm1, %v8_v16  }
  0x78   :  { %v14_v18 = vpop.permute.xlu0 %13   ;;  %v26_v19 = vpop.permute.xlu1 %25  }
  0x79   :  { %16 = vst.msk [vmem:[#allocation0] sm:$0x1] %vm15_vm2, %v14_v18  }
  0x7a   :  { %22 = vst.msk [vmem:[#allocation0] sm:$0x1] %vm21_vm3, %v20_v17  }
  0x7b   :  { %28 = vst.msk [vmem:[#allocation0] sm:$0x1] %vm27_vm4, %v26_v19  }
  0x7c   :  { %v32_v20 = vpop.permute.xlu0 %31   ;;  %v38_v21 = vpop.permute.xlu1 %37  }
  0x7d   :  { %34 = vst.msk [vmem:[#allocation0] sm:$0x1] %vm33_vm5, %v32_v20  }
  0x7e   :  { %40 = vst.msk [vmem:[#allocation0] sm:$0x1] %vm39_vm6, %v38_v21  }
  0x80   :  { %v44_v22 = vpop.permute.xlu0 %43   ;;  %v50_v23 = vpop.permute.xlu1 %49  }
  0x81   :  { %46 = vst.msk [vmem:[#allocation0] sm:$0x1] %vm45_vm7, %v44_v22  }
  0x82   :  { %52 = vst.msk [vmem:[#allocation0] sm:$0x1] %vm51_vm8, %v50_v23  }
  0x84   :  { %v56_v24 = vpop.permute.xlu0 %55   ;;  %v62_v25 = vpop.permute.xlu1 %61  }
  0x85   :  { %58 = vst.msk [vmem:[#allocation0] sm:$0x1] %vm57_vm9, %v56_v24  }
  0x86   :  { %64 = vst.msk [vmem:[#allocation0] sm:$0x1] %vm63_vm10, %v62_v25  }
  0x88   :  { %v68_v26 = vpop.permute.xlu0 %67   ;;  %v74_v27 = vpop.permute.xlu1 %73  }
  0x89   :  { %70 = vst.msk [vmem:[#allocation0] sm:$0x1] %vm69_vm11, %v68_v26  }
  0x8a   :  { %76 = vst.msk [vmem:[#allocation0] sm:$0x1] %vm75_vm12, %v74_v27  }
  0x8c   :  { %v80_v28 = vpop.permute.xlu0 %79   ;;  %v86_v29 = vpop.permute.xlu1 %85  }
  0x8d   :  { %82 = vst.msk [vmem:[#allocation0] sm:$0x1] %vm81_vm13, %v80_v28  }
  0x8e   :  { %88 = vst.msk [vmem:[#allocation0] sm:$0x1] %vm87_vm14, %v86_v29  }
  0x90   :  { %v92_v30 = vpop.permute.xlu0 %91  }
  0x91   :  { %94 = vst.msk [vmem:[#allocation0] sm:$0x1] %vm93_vm15, %v92_v30  }
  0x98   :  { %v98_v31 = vld [vmem:[#allocation0] sm:$0x1] }
  0x99   :  { %100 = vst [vmem:[%s208_s1] sm:$0x1] %v98_v31 }

// kernel: tile.54
= control target key start
LH: loop header
LB: loop body
LE: loop exit
PB: predicated region body
PF: predicated region fallthrough
CT: control target
= control target key end

     0   :  { %vm6_vm0 = vcmask 1043458   ;;  %vm10_vm1 = vcmask 1045508   ;;  %s15_s6 = smov 3  ;;  %s18_s7 = smov 12  ;;  %vm12_vm2 = vcmask 64512   ;;  %vm29_vm3 = vcmask 1048512   ;;  %s578_s0 = inlined_call_operand.vmem [shape: f32[6,16,8], index: 0, kind: input, shape index: {}]   ;;  %s579_s1 = inlined_call_operand.vmem [shape: f32[6,128], index: 1, kind: output, shape index: {}]  }
   0x1   :  { %v269_v0 = vld [vmem:[%s578_s0 + $0xf] ss:$16 sm:%s15_s6]   ;;  %s23_s12 = smov 48  ;;  %s49_s15 = smov 3  ;;  %vm46_vm4 = vcmask 982912   ;;  %vm63_vm5 = vcmask 917312  }
   0x2   :  { %v270_v1 = vld [vmem:[%s578_s0 + $0xf] ss:$16 sm:%s18_s7]   ;;  %s52_s16 = smov 12  ;;  %v275_v5 = vld [vmem:[%s578_s0 + $0xd] ss:$16 sm:%s49_s15]   ;;  %s57_s21 = smov 48 }
   0x3   :  { %v21_v2 = vsel %vm6_vm0, %v270_v1, %v269_v0  ;;  %v271_v3 = vld [vmem:[%s578_s0 + $0xf] ss:$16 sm:%s23_s12]   ;;  %v276_v6 = vld [vmem:[%s578_s0 + $0xd] ss:$16 sm:%s52_s16]   ;;  %s329_s22 = smov 120   ;;  %s32_s25 = smov 3 }
   0x4   :  { %v26_v4 = vsel %vm10_vm1, %v271_v3, %v21_v2  ;;  %v55_v7 = vsel %vm6_vm0, %v276_v6, %v275_v5  ;;  %v277_v8 = vld [vmem:[%s578_s0 + $0xd] ss:$16 sm:%s57_s21]   ;;  %s35_s26 = smov 12  ;;  %v272_v10 = vld [vmem:[%s578_s0 + $0xe] ss:$16 sm:%s32_s25]   ;;  %s40_s2 = smov 48 }
   0x5   :  { %27 = vrot.lane.b32.xlu0 %v26_v4, %s329_s22  ;;  %v60_v9 = vsel %vm10_vm1, %v277_v8, %v55_v7  ;;  %v273_v11 = vld [vmem:[%s578_s0 + $0xe] ss:$16 sm:%s35_s26]   ;;  %s330_s3 = smov 104   ;;  %s66_s6 = smov 3  ;;  %vm80_vm6 = vcmask 851712   ;;  %vm97_vm7 = vcmask 786112  }
   0x6   :  { %61 = vrot.lane.b32.xlu1 %v60_v9, %s330_s3  ;;  %v38_v12 = vsel %vm6_vm0, %v273_v11, %v272_v10  ;;  %v274_v13 = vld [vmem:[%s578_s0 + $0xe] ss:$16 sm:%s40_s2]   ;;  %s69_s7 = smov 12  ;;  %s74_s12 = smov 48  ;;  %vm114_vm8 = vcmask 720512   ;;  %vm131_vm9 = vcmask 654912  }
   0x7   :  { %v43_v14 = vsel %vm10_vm1, %v274_v13, %v38_v12  ;;  %v278_v15 = vld [vmem:[%s578_s0 + $0xc] ss:$16 sm:%s66_s6]   ;;  %s331_s13 = smov 112   ;;  %s83_s16 = smov 3  ;;  %vm148_vm10 = vcmask 589312   ;;  %vm165_vm11 = vcmask 523712  }
   0x8   :  { %v279_v16 = vld [vmem:[%s578_s0 + $0xc] ss:$16 sm:%s69_s7]   ;;  %s86_s17 = smov 12  ;;  %v281_v20 = vld [vmem:[%s578_s0 + $0xb] ss:$16 sm:%s83_s16]   ;;  %s91_s22 = smov 48 }
   0x9   :  { %44 = vrot.lane.b32.xlu0 %v43_v14, %s331_s13  ;;  %v72_v17 = vsel %vm6_vm0, %v279_v16, %v278_v15  ;;  %v280_v18 = vld [vmem:[%s578_s0 + $0xc] ss:$16 sm:%s74_s12]   ;;  %s332_s23 = smov 96   ;;  %s100_s26 = smov 3  ;;  %vm182_vm12 = vcmask 458112   ;;  %vm199_vm13 = vcmask 392512  }
   0xa   :  { %v77_v19 = vsel %vm10_vm1, %v280_v18, %v72_v17  ;;  %v282_v21 = vld [vmem:[%s578_s0 + $0xb] ss:$16 sm:%s86_s17]   ;;  %s103_s27 = smov 12  ;;  %v284_v25 = vld [vmem:[%s578_s0 + $0xa] ss:$16 sm:%s100_s26]   ;;  %s108_s3 = smov 48 }
   0xb   :  { %78 = vrot.lane.b32.xlu1 %v77_v19, %s332_s23  ;;  %v89_v22 = vsel %vm6_vm0, %v282_v21, %v281_v20  ;;  %v283_v23 = vld [vmem:[%s578_s0 + $0xb] ss:$16 sm:%s91_s22]   ;;  %s333_s4 = smov 88   ;;  %s117_s7 = smov 3  ;;  %vm216_vm14 = vcmask 326912   ;;  %vm233_vm15 = vcmask 261312  }
   0xc   :  { %v94_v24 = vsel %vm10_vm1, %v283_v23, %v89_v22  ;;  %v285_v26 = vld [vmem:[%s578_s0 + $0xa] ss:$16 sm:%s103_s27]   ;;  %s120_s8 = smov 12  ;;  %v287_v30 = vld [vmem:[%s578_s0 + $0x9] ss:$16 sm:%s117_s7]   ;;  %s125_s13 = smov 48 }
   0xd   :  { %95 = vrot.lane.b32.xlu0 %v94_v24, %s333_s4  ;;  %v106_v27 = vsel %vm6_vm0, %v285_v26, %v284_v25  ;;  %v286_v28 = vld [vmem:[%s578_s0 + $0xa] ss:$16 sm:%s108_s3]   ;;  %s334_s14 = smov 80   ;;  %s134_s17 = smov 3 }
   0xe   :  { %v111_v29 = vsel %vm10_vm1, %v286_v28, %v106_v27  ;;  %v288_v31 = vld [vmem:[%s578_s0 + $0x9] ss:$16 sm:%s120_s8]   ;;  %s137_s18 = smov 12  ;;  %v290_v35 = vld [vmem:[%s578_s0 + $0x8] ss:$16 sm:%s134_s17]   ;;  %s142_s23 = smov 48 }
   0xf   :  { %112 = vrot.lane.b32.xlu1 %v111_v29, %s334_s14  ;;  %v123_v32 = vsel %vm6_vm0, %v288_v31, %v287_v30  ;;  %v289_v33 = vld [vmem:[%s578_s0 + $0x9] ss:$16 sm:%s125_s13]   ;;  %s335_s24 = smov 72   ;;  %s151_s27 = smov 3 }
  0x10   :  { %v128_v34 = vsel %vm10_vm1, %v289_v33, %v123_v32  ;;  %v291_v36 = vld [vmem:[%s578_s0 + $0x8] ss:$16 sm:%s137_s18]   ;;  %s154_s28 = smov 12  ;;  %v293_v40 = vld [vmem:[%s578_s0 + $0x7] ss:$16 sm:%s151_s27]   ;;  %s159_s4 = smov 48 }
  0x11   :  { %129 = vrot.lane.b32.xlu0 %v128_v34, %s335_s24  ;;  %v140_v37 = vsel %vm6_vm0, %v291_v36, %v290_v35  ;;  %v292_v38 = vld [vmem:[%s578_s0 + $0x8] ss:$16 sm:%s142_s23]   ;;  %s336_s5 = smov 64   ;;  %s168_s8 = smov 3 }
  0x12   :  { %v145_v39 = vsel %vm10_vm1, %v292_v38, %v140_v37  ;;  %v294_v41 = vld [vmem:[%s578_s0 + $0x7] ss:$16 sm:%s154_s28]   ;;  %s171_s9 = smov 12  ;;  %v296_v45 = vld [vmem:[%s578_s0 + $0x6] ss:$16 sm:%s168_s8]   ;;  %s176_s14 = smov 48 }
  0x13   :  { %146 = vrot.lane.b32.xlu1 %v145_v39, %s336_s5  ;;  %v157_v42 = vsel %vm6_vm0, %v294_v41, %v293_v40  ;;  %v295_v43 = vld [vmem:[%s578_s0 + $0x7] ss:$16 sm:%s159_s4]   ;;  %s337_s15 = smov 56   ;;  %s185_s18 = smov 3 }
  0x14   :  { %v162_v44 = vsel %vm10_vm1, %v295_v43, %v157_v42  ;;  %v297_v46 = vld [vmem:[%s578_s0 + $0x6] ss:$16 sm:%s171_s9]   ;;  %s188_s19 = smov 12  ;;  %v299_v50 = vld [vmem:[%s578_s0 + $0x5] ss:$16 sm:%s185_s18]   ;;  %s193_s24 = smov 48 }
  0x15   :  { %163 = vrot.lane.b32.xlu0 %v162_v44, %s337_s15  ;;  %v174_v47 = vsel %vm6_vm0, %v297_v46, %v296_v45  ;;  %v298_v48 = vld [vmem:[%s578_s0 + $0x6] ss:$16 sm:%s176_s14]   ;;  %s338_s25 = smov 48   ;;  %s202_s28 = smov 3 }
  0x16   :  { %v179_v49 = vsel %vm10_vm1, %v298_v48, %v174_v47  ;;  %v300_v51 = vld [vmem:[%s578_s0 + $0x5] ss:$16 sm:%s188_s19]   ;;  %s205_s29 = smov 12  ;;  %v302_v55 = vld [vmem:[%s578_s0 + $0x4] ss:$16 sm:%s202_s28]   ;;  %s210_s5 = smov 48 }
  0x17   :  { %180 = vrot.lane.b32.xlu1 %v179_v49, %s338_s25  ;;  %v191_v52 = vsel %vm6_vm0, %v300_v51, %v299_v50  ;;  %v301_v53 = vld [vmem:[%s578_s0 + $0x5] ss:$16 sm:%s193_s24]   ;;  %s339_s6 = smov 40   ;;  %s219_s9 = smov 3 }
  0x18   :  { %v196_v54 = vsel %vm10_vm1, %v301_v53, %v191_v52  ;;  %v303_v56 = vld [vmem:[%s578_s0 + $0x4] ss:$16 sm:%s205_s29]   ;;  %s222_s10 = smov 12  ;;  %v305_v60 = vld [vmem:[%s578_s0 + $0x3] ss:$16 sm:%s219_s9]   ;;  %s227_s15 = smov 48 }
  0x19   :  { %197 = vrot.lane.b32.xlu0 %v196_v54, %s339_s6  ;;  %v208_v57 = vsel %vm6_vm0, %v303_v56, %v302_v55  ;;  %v304_v58 = vld [vmem:[%s578_s0 + $0x4] ss:$16 sm:%s210_s5]   ;;  %s340_s16 = smov 32   ;;  %s236_s19 = smov 3 }
  0x1a   :  { %v213_v59 = vsel %vm10_vm1, %v304_v58, %v208_v57  ;;  %v306_v61 = vld [vmem:[%s578_s0 + $0x3] ss:$16 sm:%s222_s10]   ;;  %s239_s20 = smov 12  ;;  %v308_v1 = vld [vmem:[%s578_s0 + $0x2] ss:$16 sm:%s236_s19]   ;;  %s244_s25 = smov 48 }
  0x1b   :  { %214 = vrot.lane.b32.xlu1 %v213_v59, %s340_s16  ;;  %v225_v62 = vsel %vm6_vm0, %v306_v61, %v305_v60  ;;  %v307_v63 = vld [vmem:[%s578_s0 + $0x3] ss:$16 sm:%s227_s15]   ;;  %s341_s26 = smov 24   ;;  %s253_s29 = smov 3 }
  0x1c   :  { %v230_v0 = vsel %vm10_vm1, %v307_v63, %v225_v62  ;;  %v309_v2 = vld [vmem:[%s578_s0 + $0x2] ss:$16 sm:%s239_s20]   ;;  %s256_s30 = smov 12  ;;  %v311_v6 = vld [vmem:[%s578_s0 + $0x1] ss:$16 sm:%s253_s29]   ;;  %s261_s6 = smov 48 }
  0x1d   :  { %231 = vrot.lane.b32.xlu0 %v230_v0, %s341_s26  ;;  %v242_v3 = vsel %vm6_vm0, %v309_v2, %v308_v1  ;;  %v310_v4 = vld [vmem:[%s578_s0 + $0x2] ss:$16 sm:%s244_s25]   ;;  %s342_s7 = smov 16   ;;  %s2_s10 = smov 3 }
  0x1e   :  { %v247_v5 = vsel %vm10_vm1, %v310_v4, %v242_v3  ;;  %v312_v7 = vld [vmem:[%s578_s0 + $0x1] ss:$16 sm:%s256_s30]   ;;  %s4_s11 = smov 12  ;;  %s8_s12 = smov 48  ;;  %v3_v11 = vld [vmem:[%s578_s0] ss:$16 sm:%s2_s10]  }
  0x1f   :  { %248 = vrot.lane.b32.xlu1 %v247_v5, %s342_s7  ;;  %v259_v8 = vsel %vm6_vm0, %v312_v7, %v311_v6  ;;  %v313_v9 = vld [vmem:[%s578_s0 + $0x1] ss:$16 sm:%s261_s6]   ;;  %s343_s17 = smov 8  }
  0x20   :  { %v264_v10 = vsel %vm10_vm1, %v313_v9, %v259_v8  ;;  %v5_v12 = vld [vmem:[%s578_s0] ss:$16 sm:%s4_s11]  }
  0x21   :  { %265 = vrot.lane.b32.xlu0 %v264_v10, %s343_s17  ;;  %v7_v13 = vsel %vm6_vm0, %v5_v12, %v3_v11  ;;  %v9_v14 = vld [vmem:[%s578_s0] ss:$16 sm:%s8_s12]   ;;  %vm250_vm0 = vcmask 195712  }
  0x22   :  { %v11_v15 = vsel %vm10_vm1, %v9_v14, %v7_v13  ;;  %vm267_vm1 = vcmask 130112  }
  0x23   :  { %13 = vst.msk [vmem:[%s579_s1] sm:$0x3f] %vm12_vm2, %v11_v15  }
  0x77   :  { %v28_v16 = vpop.permute.xlu0 %27  }
  0x78   :  { %30 = vst.msk [vmem:[%s579_s1] sm:$0x3f] %vm29_vm3, %v28_v16   ;;  %v62_v17 = vpop.permute.xlu1 %61  }
  0x7b   :  { %v45_v18 = vpop.permute.xlu0 %44  }
  0x7c   :  { %47 = vst.msk [vmem:[%s579_s1] sm:$0x3f] %vm46_vm4, %v45_v18  }
  0x7d   :  { %64 = vst.msk [vmem:[%s579_s1] sm:$0x3f] %vm63_vm5, %v62_v17   ;;  %v79_v19 = vpop.permute.xlu1 %78  }
  0x7e   :  { %81 = vst.msk [vmem:[%s579_s1] sm:$0x3f] %vm80_vm6, %v79_v19  }
  0x7f   :  { %v96_v20 = vpop.permute.xlu0 %95  }
  0x80   :  { %98 = vst.msk [vmem:[%s579_s1] sm:$0x3f] %vm97_vm7, %v96_v20  }
  0x81   :  { %v113_v21 = vpop.permute.xlu1 %112  }
  0x82   :  { %115 = vst.msk [vmem:[%s579_s1] sm:$0x3f] %vm114_vm8, %v113_v21  }
  0x83   :  { %v130_v22 = vpop.permute.xlu0 %129  }
  0x84   :  { %132 = vst.msk [vmem:[%s579_s1] sm:$0x3f] %vm131_vm9, %v130_v22  }
  0x85   :  { %v147_v23 = vpop.permute.xlu1 %146  }
  0x86   :  { %149 = vst.msk [vmem:[%s579_s1] sm:$0x3f] %vm148_vm10, %v147_v23  }
  0x87   :  { %v164_v24 = vpop.permute.xlu0 %163  }
  0x88   :  { %166 = vst.msk [vmem:[%s579_s1] sm:$0x3f] %vm165_vm11, %v164_v24  }
  0x89   :  { %v181_v25 = vpop.permute.xlu1 %180  }
  0x8a   :  { %183 = vst.msk [vmem:[%s579_s1] sm:$0x3f] %vm182_vm12, %v181_v25  }
  0x8b   :  { %v198_v26 = vpop.permute.xlu0 %197  }
  0x8c   :  { %200 = vst.msk [vmem:[%s579_s1] sm:$0x3f] %vm199_vm13, %v198_v26  }
  0x8d   :  { %v215_v27 = vpop.permute.xlu1 %214  }
  0x8e   :  { %217 = vst.msk [vmem:[%s579_s1] sm:$0x3f] %vm216_vm14, %v215_v27  }
  0x8f   :  { %v232_v28 = vpop.permute.xlu0 %231  }
  0x90   :  { %234 = vst.msk [vmem:[%s579_s1] sm:$0x3f] %vm233_vm15, %v232_v28  }
  0x91   :  { %v249_v29 = vpop.permute.xlu1 %248  }
  0x92   :  { %251 = vst.msk [vmem:[%s579_s1] sm:$0x3f] %vm250_vm0, %v249_v29  }
  0x93   :  { %v266_v30 = vpop.permute.xlu0 %265  }
  0x94   :  { %268 = vst.msk [vmem:[%s579_s1] sm:$0x3f] %vm267_vm1, %v266_v30  }

// kernel: tile.59
= control target key start
LH: loop header
LB: loop body
LE: loop exit
PB: predicated region body
PF: predicated region fallthrough
CT: control target
= control target key end

     0   :  { %vm6_vm0 = vcmask 1043458   ;;  %s11_s6 = smov 3  ;;  %s14_s7 = smov 12  ;;  %vm8_vm1 = vcmask 64512   ;;  %vm20_vm2 = vcmask 1048512   ;;  %vm32_vm3 = vcmask 982912   ;;  %s381_s0 = inlined_call_operand.vmem [shape: f32[4,16,8], index: 0, kind: input, shape index: {}]   ;;  %s382_s1 = inlined_call_operand.vmem [shape: f32[4,128], index: 1, kind: output, shape index: {}]  }
   0x1   :  { %v196_v0 = vld [vmem:[%s381_s0 + $0xf] ss:$16 sm:%s11_s6]   ;;  %s35_s12 = smov 3  ;;  %s38_s15 = smov 12  ;;  %vm44_vm4 = vcmask 917312   ;;  %vm56_vm5 = vcmask 851712  }
   0x2   :  { %v197_v1 = vld [vmem:[%s381_s0 + $0xf] ss:$16 sm:%s14_s7]   ;;  %v200_v3 = vld [vmem:[%s381_s0 + $0xd] ss:$16 sm:%s35_s12]   ;;  %s241_s16 = smov 120   ;;  %s23_s19 = smov 3 }
   0x3   :  { %v17_v2 = vsel %vm6_vm0, %v197_v1, %v196_v0  ;;  %v201_v4 = vld [vmem:[%s381_s0 + $0xd] ss:$16 sm:%s38_s15]   ;;  %s26_s20 = smov 12  ;;  %v198_v6 = vld [vmem:[%s381_s0 + $0xe] ss:$16 sm:%s23_s19]   ;;  %s47_s25 = smov 3 }
   0x4   :  { %18 = vrot.lane.b32.xlu0 %v17_v2, %s241_s16  ;;  %v41_v5 = vsel %vm6_vm0, %v201_v4, %v200_v3  ;;  %v199_v7 = vld [vmem:[%s381_s0 + $0xe] ss:$16 sm:%s26_s20]   ;;  %s242_s26 = smov 104   ;;  %s50_s29 = smov 12  ;;  %vm68_vm6 = vcmask 786112   ;;  %vm80_vm7 = vcmask 720512  }
   0x5   :  { %42 = vrot.lane.b32.xlu1 %v41_v5, %s242_s26  ;;  %v29_v8 = vsel %vm6_vm0, %v199_v7, %v198_v6  ;;  %v202_v9 = vld [vmem:[%s381_s0 + $0xc] ss:$16 sm:%s47_s25]   ;;  %s59_s3 = smov 3  ;;  %s62_s4 = smov 12  ;;  %vm92_vm8 = vcmask 654912   ;;  %vm104_vm9 = vcmask 589312  }
   0x6   :  { %v203_v10 = vld [vmem:[%s381_s0 + $0xc] ss:$16 sm:%s50_s29]   ;;  %s243_s5 = smov 112   ;;  %v204_v12 = vld [vmem:[%s381_s0 + $0xb] ss:$16 sm:%s59_s3]   ;;  %s71_s8 = smov 3 }
   0x7   :  { %v53_v11 = vsel %vm6_vm0, %v203_v10, %v202_v9  ;;  %v205_v13 = vld [vmem:[%s381_s0 + $0xb] ss:$16 sm:%s62_s4]   ;;  %v206_v14 = vld [vmem:[%s381_s0 + $0xa] ss:$16 sm:%s71_s8]   ;;  %s74_s13 = smov 12  ;;  %s244_s14 = smov 96  }
   0x8   :  { %30 = vrot.lane.b32.xlu0 %v29_v8, %s243_s5  ;;  %v65_v15 = vsel %vm6_vm0, %v205_v13, %v204_v12  ;;  %v207_v16 = vld [vmem:[%s381_s0 + $0xa] ss:$16 sm:%s74_s13]   ;;  %s83_s17 = smov 3  ;;  %s86_s18 = smov 12  ;;  %vm116_vm10 = vcmask 523712   ;;  %vm128_vm11 = vcmask 458112  }
   0x9   :  { %54 = vrot.lane.b32.xlu1 %v53_v11, %s244_s14  ;;  %v77_v17 = vsel %vm6_vm0, %v207_v16, %v206_v14  ;;  %v208_v18 = vld [vmem:[%s381_s0 + $0x9] ss:$16 sm:%s83_s17]   ;;  %s95_s23 = smov 3  ;;  %s245_s24 = smov 88   ;;  %vm140_vm12 = vcmask 392512   ;;  %vm152_vm13 = vcmask 326912  }
   0xa   :  { %v209_v19 = vld [vmem:[%s381_s0 + $0x9] ss:$16 sm:%s86_s18]   ;;  %v210_v20 = vld [vmem:[%s381_s0 + $0x8] ss:$16 sm:%s95_s23]   ;;  %s98_s27 = smov 12  ;;  %s107_s30 = smov 3 }
   0xb   :  { %v89_v21 = vsel %vm6_vm0, %v209_v19, %v208_v18  ;;  %v211_v22 = vld [vmem:[%s381_s0 + $0x8] ss:$16 sm:%s98_s27]   ;;  %s110_s2 = smov 12  ;;  %s246_s3 = smov 80   ;;  %v212_v23 = vld [vmem:[%s381_s0 + $0x7] ss:$16 sm:%s107_s30]  }
   0xc   :  { %66 = vrot.lane.b32.xlu0 %v65_v15, %s245_s24  ;;  %s119_s6 = smov 3  ;;  %v101_v24 = vsel %vm6_vm0, %v211_v22, %v210_v20  ;;  %v213_v25 = vld [vmem:[%s381_s0 + $0x7] ss:$16 sm:%s110_s2]   ;;  %s122_s11 = smov 12  ;;  %vm164_vm14 = vcmask 261312   ;;  %vm176_vm15 = vcmask 195712  }
   0xd   :  { %78 = vrot.lane.b32.xlu1 %v77_v17, %s246_s3  ;;  %v214_v26 = vld [vmem:[%s381_s0 + $0x6] ss:$16 sm:%s119_s6]   ;;  %s247_s12 = smov 72   ;;  %s131_s15 = smov 3  ;;  %v113_v28 = vsel %vm6_vm0, %v213_v25, %v212_v23 }
   0xe   :  { %v215_v27 = vld [vmem:[%s381_s0 + $0x6] ss:$16 sm:%s122_s11]   ;;  %s134_s16 = smov 12  ;;  %v216_v29 = vld [vmem:[%s381_s0 + $0x5] ss:$16 sm:%s131_s15]   ;;  %s143_s19 = smov 3 }
   0xf   :  { %s248_s20 = smov 64   ;;  %v217_v30 = vld [vmem:[%s381_s0 + $0x5] ss:$16 sm:%s134_s16]   ;;  %s146_s23 = smov 12  ;;  %v125_v31 = vsel %vm6_vm0, %v215_v27, %v214_v26  ;;  %v218_v32 = vld [vmem:[%s381_s0 + $0x4] ss:$16 sm:%s143_s19]  }
  0x10   :  { %90 = vrot.lane.b32.xlu0 %v89_v21, %s247_s12  ;;  %s155_s26 = smov 3  ;;  %s158_s27 = smov 12  ;;  %v219_v33 = vld [vmem:[%s381_s0 + $0x4] ss:$16 sm:%s146_s23]   ;;  %v137_v34 = vsel %vm6_vm0, %v217_v30, %v216_v29 }
  0x11   :  { %102 = vrot.lane.b32.xlu1 %v101_v24, %s248_s20  ;;  %s249_s28 = smov 56   ;;  %s167_s2 = smov 3  ;;  %v220_v35 = vld [vmem:[%s381_s0 + $0x3] ss:$16 sm:%s155_s26]   ;;  %v149_v37 = vsel %vm6_vm0, %v219_v33, %v218_v32 }
  0x12   :  { %s170_s5 = smov 12  ;;  %s250_s6 = smov 48   ;;  %v221_v36 = vld [vmem:[%s381_s0 + $0x3] ss:$16 sm:%s158_s27]   ;;  %v222_v38 = vld [vmem:[%s381_s0 + $0x2] ss:$16 sm:%s167_s2]  }
  0x13   :  { %s179_s9 = smov 3  ;;  %v223_v39 = vld [vmem:[%s381_s0 + $0x2] ss:$16 sm:%s170_s5]   ;;  %s182_s14 = smov 12  ;;  %v161_v41 = vsel %vm6_vm0, %v221_v36, %v220_v35 }
  0x14   :  { %114 = vrot.lane.b32.xlu0 %v113_v28, %s249_s28  ;;  %s2_s15 = smov 3  ;;  %s251_s16 = smov 40   ;;  %v224_v42 = vld [vmem:[%s381_s0 + $0x1] ss:$16 sm:%s179_s9]   ;;  %v173_v46 = vsel %vm6_vm0, %v223_v39, %v222_v38 }
  0x15   :  { %126 = vrot.lane.b32.xlu1 %v125_v31, %s250_s6  ;;  %v3_v40 = vld [vmem:[%s381_s0] ss:$16 sm:%s2_s15]   ;;  %s4_s19 = smov 12  ;;  %s252_s24 = smov 32  }
  0x16   :  { %v5_v43 = vld [vmem:[%s381_s0] ss:$16 sm:%s4_s19]   ;;  %v225_v44 = vld [vmem:[%s381_s0 + $0x1] ss:$16 sm:%s182_s14]   ;;  %s253_s0 = smov 24   ;;  %s254_s27 = smov 16  }
  0x17   :  { %v7_v45 = vsel %vm6_vm0, %v5_v43, %v3_v40  ;;  %v185_v47 = vsel %vm6_vm0, %v225_v44, %v224_v42  ;;  %s255_s28 = smov 8   ;;  %vm188_vm0 = vcmask 130112  }
  0x18   :  { %138 = vrot.lane.b32.xlu0 %v137_v34, %s251_s16  ;;  %9 = vst.msk [vmem:[#allocation0] sm:$0xf] %vm8_vm1, %v7_v45  }
  0x19   :  { %150 = vrot.lane.b32.xlu1 %v149_v37, %s252_s24 }
  0x1c   :  { %162 = vrot.lane.b32.xlu0 %v161_v41, %s253_s0 }
  0x1d   :  { %174 = vrot.lane.b32.xlu1 %v173_v46, %s254_s27 }
  0x20   :  { %186 = vrot.lane.b32.xlu0 %v185_v47, %s255_s28 }
  0x76   :  { %v19_v48 = vpop.permute.xlu0 %18  }
  0x77   :  { %21 = vst.msk [vmem:[#allocation0] sm:$0xf] %vm20_vm2, %v19_v48   ;;  %v43_v49 = vpop.permute.xlu1 %42  }
  0x7a   :  { %v31_v50 = vpop.permute.xlu0 %30  }
  0x7b   :  { %33 = vst.msk [vmem:[#allocation0] sm:$0xf] %vm32_vm3, %v31_v50   ;;  %v55_v51 = vpop.permute.xlu1 %54  }
  0x7c   :  { %45 = vst.msk [vmem:[#allocation0] sm:$0xf] %vm44_vm4, %v43_v49  }
  0x7d   :  { %57 = vst.msk [vmem:[#allocation0] sm:$0xf] %vm56_vm5, %v55_v51  }
  0x7e   :  { %v67_v52 = vpop.permute.xlu0 %66  }
  0x7f   :  { %69 = vst.msk [vmem:[#allocation0] sm:$0xf] %vm68_vm6, %v67_v52   ;;  %v79_v53 = vpop.permute.xlu1 %78  }
  0x80   :  { %81 = vst.msk [vmem:[#allocation0] sm:$0xf] %vm80_vm7, %v79_v53  }
  0x82   :  { %v91_v54 = vpop.permute.xlu0 %90  }
  0x83   :  { %93 = vst.msk [vmem:[#allocation0] sm:$0xf] %vm92_vm8, %v91_v54   ;;  %v103_v55 = vpop.permute.xlu1 %102  }
  0x84   :  { %105 = vst.msk [vmem:[#allocation0] sm:$0xf] %vm104_vm9, %v103_v55  }
  0x86   :  { %v115_v56 = vpop.permute.xlu0 %114  }
  0x87   :  { %117 = vst.msk [vmem:[#allocation0] sm:$0xf] %vm116_vm10, %v115_v56   ;;  %v127_v57 = vpop.permute.xlu1 %126  }
  0x88   :  { %129 = vst.msk [vmem:[#allocation0] sm:$0xf] %vm128_vm11, %v127_v57  }
  0x8a   :  { %v139_v58 = vpop.permute.xlu0 %138  }
  0x8b   :  { %141 = vst.msk [vmem:[#allocation0] sm:$0xf] %vm140_vm12, %v139_v58   ;;  %v151_v59 = vpop.permute.xlu1 %150  }
  0x8c   :  { %153 = vst.msk [vmem:[#allocation0] sm:$0xf] %vm152_vm13, %v151_v59  }
  0x8e   :  { %v163_v60 = vpop.permute.xlu0 %162  }
  0x8f   :  { %165 = vst.msk [vmem:[#allocation0] sm:$0xf] %vm164_vm14, %v163_v60   ;;  %v175_v61 = vpop.permute.xlu1 %174  }
  0x90   :  { %177 = vst.msk [vmem:[#allocation0] sm:$0xf] %vm176_vm15, %v175_v61  }
  0x92   :  { %v187_v62 = vpop.permute.xlu0 %186  }
  0x93   :  { %189 = vst.msk [vmem:[#allocation0] sm:$0xf] %vm188_vm0, %v187_v62  }
  0x9a   :  { %v193_v63 = vld [vmem:[#allocation0] sm:$0xf] }
  0x9b   :  { %195 = vst [vmem:[%s382_s1] sm:$0xf] %v193_v63 }

// kernel: rational_basic_block_forward.5
= control target key start
LH: loop header
LB: loop body
LE: loop exit
PB: predicated region body
PF: predicated region fallthrough
CT: control target
= control target key end

     0   :  { %s474_s18 = smov 0   ;;  %s518_s0 = inlined_call_operand.vmem [shape: bf16[2,16,128], index: 0, kind: input, shape index: {}]   ;;  %s519_s1 = inlined_call_operand.vmem [shape: f32[1,128], index: 1, kind: input, shape index: {}]   ;;  %s520_s2 = inlined_call_operand.vmem [shape: f32[1,128], index: 2, kind: input, shape index: {}]   ;;  %s521_s3 = inlined_call_operand.vmem [shape: f32[6,128], index: 3, kind: input, shape index: {}]   ;;  %s522_s4 = inlined_call_operand.vmem [shape: f32[4,128], index: 4, kind: input, shape index: {}]   ;;  %s523_s5 = inlined_call_operand.vmem [shape: bf16[2,16,128], index: 5, kind: output, shape index: {}]  }
   0x1 LB: > { %s396_s19 = sadd.s32 4294967295, %s442_s18   ;;  %p400_p0 = scmp.ge.s32.totalorder %s442_s18, 1  ;;  %s442_s18 = sphi %s474_s18, %s15_s18  }
   0x2   : > { %p187_p1 = scmp.lt.s32.totalorder %s442_s18, 3 }
   0x4   : > { %p188_p2 = pnand %p400_p0, %p187_p1 }
   0x5   : > { %p215_p3 = scmp.lt.s32.totalorder (!%p188_p2), %s396_s19, 1  ;;  %v249_v0 = vlaneseq (!%p188_p2)  ;;  %v405_v2 = vld [vmem:[%s519_s1] ss:$0 sm:$0xff] (!%p188_p2) }
   0x6   : > { %191 = sbr.rel (%p188_p2) target bundleno = 58 (0x3a), region = 40  ;;  %v247_v6 = vld [vmem:[%s521_s3] sm:$0x3f] (!%p188_p2) }
   0x7   : > { %v484_v1 = vshrl.u32 (!%p188_p2), %v249_v0, 7  ;;  %v248_v7 = vld [vmem:[%s522_s4] sm:$0xf] (!%p188_p2) }
   0x8   : > { %v406_v12 = vld [vmem:[%s520_s2] ss:$0 sm:$0xff] (!%p188_p2) }
   0x9   : > { %v251_v3 = vsub.s32 (!%p188_p2), 5, %v484_v1  ;;  %v265_v4 = vsub.s32 (!%p188_p2), 3, %v484_v1  ;;  %v257_v10 = vsub.s32 (!%p188_p2), 4, %v484_v1  ;;  %v273_v11 = vsub.s32 (!%p188_p2), 2, %v484_v1 }
   0xa   : > { %v281_v17 = vsub.s32 (!%p188_p2), 1, %v484_v1  ;;  %v289_v27 = vsub.s32 (!%p188_p2), 0, %v484_v1 }
   0xb   : > { %v252_v15 = vrot.slane (!%p188_p2), %v247_v6, %v251_v3  ;;  %v296_v16 = vrot.slane (!%p188_p2), %v248_v7, %v265_v4  ;;  %v258_v20 = vrot.slane (!%p188_p2), %v247_v6, %v257_v10  ;;  %v302_v21 = vrot.slane (!%p188_p2), %v248_v7, %v273_v11 }
   0xc   : > { %v266_v26 = vrot.slane (!%p188_p2), %v247_v6, %v265_v4  ;;  %v310_v28 = vrot.slane (!%p188_p2), %v248_v7, %v281_v17  ;;  %v274_v37 = vrot.slane (!%p188_p2), %v247_v6, %v273_v11  ;;  %v318_v38 = vrot.slane (!%p188_p2), %v248_v7, %v289_v27 }
   0xd   : > { %s525_s19 = smov (!%p215_p3, %s396_s19), 1  ;;  %v282_v54 = vrot.slane %v247_v6, %v281_v17  ;;  %v290_v63 = vrot.slane %v247_v6, %v289_v27 }
   0xe   : > { %s411_s20 = sshll.u32 %s525_s19, 3 }
   0xf   : > { %s219_s23 = scalar_lea.vmem %s518_s0, %s411_s20  ;;  %s224_s9 = scalar_lea.vmem %s523_s5, %s411_s20 }
  0x10   : > { %v416_v5 = vld [vmem:[%s219_s23] sm:$0xff]  }
  0x11   : > { %v417_v8 = vunpack.c.l.bf16 %v416_v5  ;;  %v418_v9 = vunpack.c.h.bf16 %v416_v5 }
  0x13   : > { %v236_v13 = vmul.f32 %v417_v8, %v405_v2  ;;  %v237_v14 = vmul.f32 %v418_v9, %v405_v2 }
  0x15   : > { %v245_v18 = vadd.f32 %v406_v12, %v236_v13  ;;  %v246_v19 = vadd.f32 %v406_v12, %v237_v14 }
  0x17   : > { %v253_v22 = vmul.f32 %v252_v15, %v245_v18  ;;  %v254_v23 = vmul.f32 %v252_v15, %v246_v19  ;;  %v297_v24 = vmul.f32 %v296_v16, %v245_v18  ;;  %v298_v25 = vmul.f32 %v296_v16, %v246_v19 }
  0x19   : > { %v259_v29 = vadd.f32 %v258_v20, %v253_v22  ;;  %v260_v30 = vadd.f32 %v258_v20, %v254_v23  ;;  %v303_v31 = vadd.f32 %v302_v21, %v297_v24  ;;  %v304_v32 = vadd.f32 %v302_v21, %v298_v25 }
  0x1b   : > { %v261_v33 = vmul.f32 %v259_v29, %v245_v18  ;;  %v262_v34 = vmul.f32 %v260_v30, %v246_v19  ;;  %v305_v35 = vmul.f32 %v303_v31, %v245_v18  ;;  %v306_v36 = vmul.f32 %v304_v32, %v246_v19 }
  0x1d   : > { %v267_v39 = vadd.f32 %v266_v26, %v261_v33  ;;  %v268_v40 = vadd.f32 %v266_v26, %v262_v34  ;;  %v311_v41 = vadd.f32 %v310_v28, %v305_v35  ;;  %v312_v42 = vadd.f32 %v310_v28, %v306_v36 }
  0x1f   : > { %v269_v43 = vmul.f32 %v267_v39, %v245_v18  ;;  %v270_v44 = vmul.f32 %v268_v40, %v246_v19  ;;  %v313_v45 = vmul.f32 %v311_v41, %v245_v18  ;;  %v314_v46 = vmul.f32 %v312_v42, %v246_v19 }
  0x21   : > { %v275_v47 = vadd.f32 %v274_v37, %v269_v43  ;;  %v276_v48 = vadd.f32 %v274_v37, %v270_v44  ;;  %v319_v49 = vadd.f32 %v318_v38, %v313_v45  ;;  %v320_v50 = vadd.f32 %v318_v38, %v314_v46 }
  0x23   : > { %v321_v51 = vmul.f32 %v319_v49, %v245_v18  ;;  %v322_v52 = vmul.f32 %v320_v50, %v246_v19  ;;  %v277_v53 = vmul.f32 %v275_v47, %v245_v18  ;;  %v278_v55 = vmul.f32 %v276_v48, %v246_v19 }
  0x25   : > { %v323_v56 = vand.u32 2147483647, %v321_v51  ;;  %v324_v57 = vand.u32 2147483647, %v322_v52  ;;  %v283_v60 = vadd.f32 %v282_v54, %v277_v53  ;;  %v284_v61 = vadd.f32 %v282_v54, %v278_v55 }
  0x27   : > { %v325_v58 = vadd.f32 1.0, %v323_v56  ;;  %v326_v59 = vadd.f32 1.0, %v324_v57  ;;  %v285_v62 = vmul.f32 %v283_v60, %v245_v18  ;;  %v286_v0 = vmul.f32 %v284_v61, %v246_v19 }
  0x29   : > { %432 = vrcp.f32 %v325_v58  ;;  %v291_v1 = vadd.f32 %v290_v63, %v285_v62  ;;  %v292_v2 = vadd.f32 %v290_v63, %v286_v0 }
  0x2a   : > { %434 = vrcp.f32 %v326_v59 }
  0x33   : > { %v433_v3 = vpop.eup %432 }
  0x34   : > { %v435_v4 = vpop.eup %434  ;;  %v329_v5 = vmul.f32 %v433_v3, %v291_v1 }
  0x35   : > { %v330_v7 = vmul.f32 %v435_v4, %v292_v2 }
  0x37   : > { %v422_v8 = vpack.c.bf16 %v330_v7, %v329_v5 }
  0x39   : > { %423 = vst [vmem:[%s224_s9] sm:$0xff] %v422_v8  }
  0x3a PF: > { %s15_s18 = sadd.s32 1, %s442_s18  }
  0x3b   : > { %p12_p4 = scmp.ge.s32.totalorder %s15_s18, 4  }
  0x3d   :  { %14 = sbr.rel (!%p12_p4) target bundleno = 1 (0x1), region = 70 }

// kernel: rational_basic_block_forward.7
= control target key start
LH: loop header
LB: loop body
LE: loop exit
PB: predicated region body
PF: predicated region fallthrough
CT: control target
= control target key end

     0   :  { %s534_s21 = smov 0   ;;  %s578_s0 = inlined_call_operand.vmem [shape: bf16[2,16,128], index: 0, kind: input, shape index: {}]   ;;  %s579_s1 = inlined_call_operand.vmem [shape: f32[1,128], index: 1, kind: input, shape index: {}]   ;;  %s580_s2 = inlined_call_operand.vmem [shape: f32[1,128], index: 2, kind: input, shape index: {}]   ;;  %s581_s3 = inlined_call_operand.vmem [shape: f32[6,128], index: 3, kind: input, shape index: {}]   ;;  %s582_s4 = inlined_call_operand.vmem [shape: f32[4,128], index: 4, kind: input, shape index: {}]   ;;  %s583_s5 = inlined_call_operand.vmem [shape: bf16[2,16,128], index: 5, kind: input, shape index: {}]   ;;  %s584_s6 = inlined_call_operand.vmem [shape: f32[2,16,128], index: 6, kind: output, shape index: {}]  }
   0x1 LB: > { %s453_s22 = sadd.s32 4294967295, %s497_s21   ;;  %p457_p0 = scmp.ge.s32.totalorder %s497_s21, 1  ;;  %s497_s21 = sphi %s534_s21, %s16_s21  }
   0x2   : > { %p222_p1 = scmp.lt.s32.totalorder %s497_s21, 3 }
   0x4   : > { %p223_p2 = pnand %p457_p0, %p222_p1 }
   0x5   : > { %p257_p3 = scmp.lt.s32.totalorder (!%p223_p2), %s453_s22, 1  ;;  %v302_v0 = vlaneseq (!%p223_p2)  ;;  %v464_v3 = vld [vmem:[%s579_s1] ss:$0 sm:$0xff] (!%p223_p2) }
   0x6   : > { %226 = sbr.rel (%p223_p2) target bundleno = 58 (0x3a), region = 44  ;;  %v465_v7 = vld [vmem:[%s580_s2] ss:$0 sm:$0xff] (!%p223_p2) }
   0x7   : > { %v544_v1 = vshrl.u32 (!%p223_p2), %v302_v0, 7  ;;  %v300_v10 = vld [vmem:[%s581_s3] sm:$0x3f] (!%p223_p2) }
   0x8   : > { %v301_v11 = vld [vmem:[%s582_s4] sm:$0xf] (!%p223_p2) }
   0x9   : > { %v304_v8 = vsub.s32 (!%p223_p2), 5, %v544_v1  ;;  %v318_v9 = vsub.s32 (!%p223_p2), 3, %v544_v1  ;;  %v310_v12 = vsub.s32 (!%p223_p2), 4, %v544_v1  ;;  %v326_v13 = vsub.s32 (!%p223_p2), 2, %v544_v1 }
   0xa   : > { %v334_v22 = vsub.s32 (!%p223_p2), 1, %v544_v1  ;;  %v342_v32 = vsub.s32 (!%p223_p2), 0, %v544_v1 }
   0xb   : > { %v305_v20 = vrot.slane (!%p223_p2), %v300_v10, %v304_v8  ;;  %v349_v21 = vrot.slane (!%p223_p2), %v301_v11, %v318_v9  ;;  %v311_v25 = vrot.slane (!%p223_p2), %v300_v10, %v310_v12  ;;  %v355_v26 = vrot.slane (!%p223_p2), %v301_v11, %v326_v13 }
   0xc   : > { %v319_v31 = vrot.slane (!%p223_p2), %v300_v10, %v318_v9  ;;  %v363_v33 = vrot.slane (!%p223_p2), %v301_v11, %v334_v22  ;;  %v327_v42 = vrot.slane (!%p223_p2), %v300_v10, %v326_v13  ;;  %v371_v43 = vrot.slane (!%p223_p2), %v301_v11, %v342_v32 }
   0xd   : > { %s586_s22 = smov (!%p257_p3, %s453_s22), 1  ;;  %v335_v59 = vrot.slane %v300_v10, %v334_v22 }
   0xe   : > { %s468_s23 = sshll.u32 %s586_s22, 3  ;;  %s470_s14 = sshll.u32 %s586_s22, 4 }
   0xf   : > { %s261_s26 = scalar_lea.vmem %s578_s0, %s468_s23  ;;  %s266_s29 = scalar_lea.vmem %s583_s5, %s468_s23 }
  0x10   : > { %v472_v2 = vld [vmem:[%s261_s26] sm:$0xff]   ;;  %s271_s17 = scalar_lea.vmem %s584_s6, %s470_s14 }
  0x11   : > { %v476_v4 = vld [vmem:[%s266_s29] sm:$0xff]   ;;  %v473_v5 = vunpack.c.l.bf16 %v472_v2  ;;  %v474_v6 = vunpack.c.h.bf16 %v472_v2 }
  0x12   : > { %v477_v16 = vunpack.c.l.bf16 %v476_v4  ;;  %v478_v17 = vunpack.c.h.bf16 %v476_v4  ;;  %v343_v4 = vrot.slane %v300_v10, %v342_v32 }
  0x13   : > { %v283_v14 = vmul.f32 %v473_v5, %v464_v3  ;;  %v284_v15 = vmul.f32 %v474_v6, %v464_v3 }
  0x15   : > { %v292_v18 = vadd.f32 %v465_v7, %v283_v14  ;;  %v293_v19 = vadd.f32 %v465_v7, %v284_v15 }
  0x17   : > { %v298_v23 = vadd.f32 %v477_v16, %v292_v18  ;;  %v299_v24 = vadd.f32 %v478_v17, %v293_v19 }
  0x19   : > { %v306_v27 = vmul.f32 %v305_v20, %v298_v23  ;;  %v350_v28 = vmul.f32 %v349_v21, %v298_v23  ;;  %v351_v29 = vmul.f32 %v349_v21, %v299_v24  ;;  %v307_v30 = vmul.f32 %v305_v20, %v299_v24 }
  0x1b   : > { %v312_v34 = vadd.f32 %v311_v25, %v306_v27  ;;  %v356_v35 = vadd.f32 %v355_v26, %v350_v28  ;;  %v357_v36 = vadd.f32 %v355_v26, %v351_v29  ;;  %v313_v37 = vadd.f32 %v311_v25, %v307_v30 }
  0x1d   : > { %v314_v38 = vmul.f32 %v312_v34, %v298_v23  ;;  %v358_v39 = vmul.f32 %v356_v35, %v298_v23  ;;  %v359_v40 = vmul.f32 %v357_v36, %v299_v24  ;;  %v315_v41 = vmul.f32 %v313_v37, %v299_v24 }
  0x1f   : > { %v320_v44 = vadd.f32 %v319_v31, %v314_v38  ;;  %v364_v45 = vadd.f32 %v363_v33, %v358_v39  ;;  %v365_v46 = vadd.f32 %v363_v33, %v359_v40  ;;  %v321_v47 = vadd.f32 %v319_v31, %v315_v41 }
  0x21   : > { %v322_v48 = vmul.f32 %v320_v44, %v298_v23  ;;  %v366_v49 = vmul.f32 %v364_v45, %v298_v23  ;;  %v367_v50 = vmul.f32 %v365_v46, %v299_v24  ;;  %v323_v51 = vmul.f32 %v321_v47, %v299_v24 }
  0x23   : > { %v328_v52 = vadd.f32 %v327_v42, %v322_v48  ;;  %v372_v53 = vadd.f32 %v371_v43, %v366_v49  ;;  %v373_v54 = vadd.f32 %v371_v43, %v367_v50  ;;  %v329_v55 = vadd.f32 %v327_v42, %v323_v51 }
  0x25   : > { %v374_v56 = vmul.f32 %v372_v53, %v298_v23  ;;  %v375_v57 = vmul.f32 %v373_v54, %v299_v24  ;;  %v330_v58 = vmul.f32 %v328_v52, %v298_v23  ;;  %v331_v61 = vmul.f32 %v329_v55, %v299_v24 }
  0x27   : > { %v376_v60 = vand.u32 2147483647, %v374_v56  ;;  %v377_v62 = vand.u32 2147483647, %v375_v57  ;;  %v336_v1 = vadd.f32 %v335_v59, %v330_v58  ;;  %v337_v2 = vadd.f32 %v335_v59, %v331_v61 }
  0x29   : > { %v378_v63 = vadd.f32 1.0, %v376_v60  ;;  %v379_v0 = vadd.f32 1.0, %v377_v62  ;;  %v338_v3 = vmul.f32 %v336_v1, %v298_v23  ;;  %v339_v5 = vmul.f32 %v337_v2, %v299_v24 }
  0x2b   : > { %487 = vrcp.f32 %v378_v63  ;;  %v344_v6 = vadd.f32 %v343_v4, %v338_v3  ;;  %v345_v7 = vadd.f32 %v343_v4, %v339_v5 }
  0x2c   : > { %489 = vrcp.f32 %v379_v0 }
  0x35   : > { %v488_v8 = vpop.eup %487 }
  0x36   : > { %v490_v9 = vpop.eup %489  ;;  %v382_v11 = vmul.f32 %v488_v8, %v344_v6 }
  0x37   : > { %v383_v12 = vmul.f32 %v490_v9, %v345_v7 }
  0x38   : > { %384 = vst [vmem:[%s271_s17] sm:$0xff] %v382_v11 }
  0x39   : > { %385 = vst [vmem:[%s271_s17 + $0x8] sm:$0xff] %v383_v12 }
  0x3a PF: > { %s16_s21 = sadd.s32 1, %s497_s21  }
  0x3b   : > { %p13_p4 = scmp.ge.s32.totalorder %s16_s21, 4  }
  0x3d   :  { %15 = sbr.rel (!%p13_p4) target bundleno = 1 (0x1), region = 77 }

// kernel: rational_basic_block_forward.4
= control target key start
LH: loop header
LB: loop body
LE: loop exit
PB: predicated region body
PF: predicated region fallthrough
CT: control target
= control target key end

     0   :  { %s2130_s12 = smov 0   ;;  %s2778_s0 = inlined_call_operand.vmem [shape: bf16[2,18,18,8], index: 0, kind: input, shape index: {}]   ;;  %s2779_s1 = inlined_call_operand.vmem [shape: bf16[72,8], index: 1, kind: input, shape index: {}]   ;;  %s2780_s2 = inlined_call_operand.vmem [shape: bf16[2,256,8], index: 2, kind: output, shape index: {0}]   ;;  %s2781_s3 = inlined_call_operand.vmem [shape: f32[2,2,8], index: 3, kind: output, shape index: {1}]  }
   0x1 LB: > { %s1828_s13 = sadd.s32 4294967295, %s2100_s12   ;;  %p1832_p0 = scmp.ge.s32.totalorder %s2100_s12, 1  ;;  %s2100_s12 = sphi %s2130_s12, %s14_s12  }
   0x2   : > { %p140_p1 = scmp.lt.s32.totalorder %s2100_s12, 3 }
   0x4   : > { %p141_p2 = pnand %p1832_p0, %p140_p1 }
   0x5   : > { %p168_p3 = scmp.lt.s32.totalorder (!%p141_p2), %s1828_s13, 1  ;;  %vm590_vm0 = vcmask (!%p141_p2), 1046528   ;;  %s2102_s18 = smov (!%p141_p2), 24   ;;  %vm365_vm1 = vsmask.f32 (!%p141_p2), 7424  ;;  %v2073_v44 = vld [vmem:[%s2779_s1] sm:$0xff] (!%p141_p2)  }
   0x6   : > { %144 = sbr.rel (%p141_p2) target bundleno = 625 (0x271), region = 28  ;;  %s2103_s19 = smov (!%p141_p2), 40   ;;  %1982 = vmatprep.subr.bf16.mxu0 (!%p141_p2), %v2073_v44  ;;  %v2074_v45 = vld [vmem:[%s2779_s1 + $0x8] sm:$0xff] (!%p141_p2)   ;;  %2024 = vmatprep.subr.bf16.mxu1 (!%p141_p2), %v2073_v44  ;;  %v2075_v47 = vld [vmem:[%s2779_s1 + $0x10] sm:$0xff] (!%p141_p2)   ;;  %v2077_v51 = vld [vmem:[%s2779_s1 + $0x18] sm:$0xff] (!%p141_p2)   ;;  %vm1242_vm2 = vcmask (!%p141_p2), 1043456  }
   0x7   : > { %s2104_s20 = smov (!%p141_p2), 16   ;;  %s2105_s21 = smov (!%p141_p2), 8   ;;  %1983 = vmatpush3.bf16.msra.mxu0 (!%p141_p2), %v2073_v44  ;;  %2029 = vmatpush3.bf16.msra.mxu1 (!%p141_p2), %v2073_v44  ;;  %v2079_v55 = vld [vmem:[%s2779_s1 + $0x20] ss:$0 sps:$4 sm:$0xff] (!%p141_p2)   ;;  %vm909_vm3 = vcmask (!%p141_p2), 64512   ;;  %vm942_vm4 = vcmask (!%p141_p2), 130048  }
   0x8   : > { %s2106_s22 = smov (!%p141_p2), 32   ;;  %s2107_s25 = smov (!%p141_p2), 48   ;;  %1984 = vmatprep.subr.bf16.mxu0 (!%p141_p2), %v2074_v45  ;;  %2025 = vmatprep.subr.bf16.mxu1 (!%p141_p2), %v2074_v45  ;;  %v1244_v59 = vsel (!%p141_p2), %vm1242_vm2, %v2079_v55, 0  ;;  %vm975_vm5 = vcmask (!%p141_p2), 195584   ;;  %vm1008_vm6 = vcmask (!%p141_p2), 261120   ;;  %vm1041_vm7 = vcmask (!%p141_p2), 326656  }
   0x9   : > { %s2108_s30 = smov (!%p141_p2), 56   ;;  %s2109_s6 = smov (!%p141_p2), 64   ;;  %vm1074_vm8 = vcmask (!%p141_p2), 392192   ;;  %vm1107_vm9 = vcmask (!%p141_p2), 457728   ;;  %vm1140_vm10 = vcmask (!%p141_p2), 523264   ;;  %vm1209_vm11 = vcmask (!%p141_p2), 588800  }
   0xa   : > { %vm1709_vm12 = vcmask (!%p141_p2), 60416   ;;  %vm1577_vm13 = vcmask (!%p141_p2), 1040384   ;;  %vm1579_vm14 = vcmask (!%p141_p2), 58368  }
   0xb   : > { %1985 = vmatpush3.bf16.msra.mxu0 (!%p141_p2), %v2074_v45  ;;  %2030 = vmatpush3.bf16.msra.mxu1 (!%p141_p2), %v2074_v45 }
   0xc   : > { %1986 = vmatprep.subr.bf16.mxu0 (!%p141_p2), %v2075_v47  ;;  %2026 = vmatprep.subr.bf16.mxu1 (!%p141_p2), %v2075_v47 }
   0xd   : > { %s2783_s13 = smov (!%p168_p3, %s1828_s13), 1 }
   0xe   : > { %s2036_s14 = smul.u32 216, %s2783_s13  ;;  %s1928_s9 = sshll.u32 %s2783_s13, 7 }
   0xf   : > { %1987 = vmatpush3.bf16.msra.mxu0 %v2075_v47  ;;  %2031 = vmatpush3.bf16.msra.mxu1 %v2075_v47  ;;  %s1836_s15 = sshll.u32 %s2783_s13, 1 }
  0x10   : > { %s2144_s17 = scalar_lea.vmem %s2778_s0, %s2036_s14  ;;  %1988 = vmatprep.subr.bf16.mxu0 %v2077_v51  ;;  %2027 = vmatprep.subr.bf16.mxu1 %v2077_v51  ;;  %s2626_s14 = scalar_lea.vmem %s2780_s2, %s1928_s9 }
  0x11   : > { %v2147_v0 = vld [vmem:[%s2144_s17 + $0x18] sm:$0xff]   ;;  %v2150_v1 = vld [vmem:[%s2144_s17 + $0xc] sm:$0xff]   ;;  %v2055_v2 = vld [vmem:[%s2144_s17 + $0x14] ss:$0 sps:$4 sm:$0x11]  }
  0x12   : > { %678 = vrot.lane.b32.xlu1 %v2147_v0, %s2102_s18  ;;  %v2156_v3 = vld [vmem:[%s2144_s17] sm:$0xff]   ;;  %676 = vrot.lane.b32.xlu0 %v2150_v1, %s2102_s18  ;;  %v594_v4 = vrot.slane %v2150_v1, 1  ;;  %v595_v5 = vrot.slane %v2055_v2, 1  ;;  %v2057_v6 = vld [vmem:[%s2144_s17 + $0x8] ss:$0 sps:$4 sm:$0x11]  }
  0x13   : > { %v591_v7 = vrot.slane %v2156_v3, 1  ;;  %v367_v8 = vshrl.u32 %v2156_v3, 16  ;;  %v369_v9 = vshll.u32 %v2156_v3, 16  ;;  %v379_v10 = vshrl.u32 %v2150_v1, 16  ;;  %v2176_v30 = vld [vmem:[%s2144_s17 + $0x24] sm:$0xff]   ;;  %v2209_v50 = vld [vmem:[%s2144_s17 + $0x30] sm:$0xff]   ;;  %1989 = vmatpush3.bf16.msra.mxu0 %v2077_v51  ;;  %2032 = vmatpush3.bf16.msra.mxu1 %v2077_v51 }
  0x14   : > { %v596_v11 = vsel %vm590_vm0, %v594_v4, %v595_v5  ;;  %v592_v12 = vrot.slane %v2057_v6, 1  ;;  %v374_v13 = vshll.u32 %v2057_v6, 16  ;;  %v2058_v14 = vld [vmem:[%s2144_s17 + $0x20] ss:$0 sps:$4 sm:$0x11]   ;;  %v381_v15 = vshll.u32 %v2150_v1, 16  ;;  %2034 = vmatprep.subr.msk.bf16.mxu0 %vm1242_vm2, %v2079_v55  ;;  %2035 = vmatprep.subr.msk.bf16.mxu1 %vm1242_vm2, %v2079_v55 }
  0x15   : > { %v371_v16 = vrot.slane %v369_v9, 1  ;;  %v386_v17 = vshll.u32 %v2055_v2, 16  ;;  %v393_v18 = vshll.u32 %v2147_v0, 16  ;;  %v597_v23 = vrot.slane %v2147_v0, 1  ;;  %v2228_v62 = vld [vmem:[%s2144_s17 + $0x3c] sm:$0xff]   ;;  %v2304_v51 = vld [vmem:[%s2144_s17 + $0x6c] sm:$0xff]  }
  0x16   : > { %758 = vrot.lane.b32.xlu0 %v596_v11, %s2103_s19  ;;  %v593_v19 = vsel %vm590_vm0, %v591_v7, %v592_v12  ;;  %v376_v20 = vrot.slane %v374_v13, 1  ;;  %v383_v21 = vrot.slane %v381_v15, 1  ;;  %v391_v25 = vshrl.u32 %v2147_v0, 16  ;;  %v2060_v33 = vld [vmem:[%s2144_s17 + $0x2c] ss:$0 sps:$4 sm:$0x11]  }
  0x17   : > { %639 = vrot.lane.b32.xlu1 %v593_v19, %s2104_s20  ;;  %v372_v22 = vor.u32 %v371_v16, %v367_v8  ;;  %v388_v24 = vrot.slane %v386_v17, 1  ;;  %v598_v26 = vrot.slane %v2058_v14, 1  ;;  %v395_v28 = vrot.slane %v393_v18, 1  ;;  %v2062_v53 = vld [vmem:[%s2144_s17 + $0x38] ss:$0 sps:$4 sm:$0x11]   ;;  %1991 = vmatpush3.bf16.msra.mxu0 %v1244_v59 }
  0x18   : > { %v384_v27 = vor.u32 %v383_v21, %v379_v10  ;;  %v398_v29 = vshll.u32 %v2058_v14, 16  ;;  %v405_v37 = vshll.u32 %v2176_v30, 16  ;;  %v403_v39 = vshrl.u32 %v2176_v30, 16  ;;  %2033 = vmatpush3.bf16.msra.mxu1 %v1244_v59  ;;  %v2064_v5 = vld [vmem:[%s2144_s17 + $0x44] ss:$0 sps:$4 sm:$0x11]  }
  0x19   : > { %v377_v31 = vsel %vm365_vm1, %v372_v22, %v376_v20  ;;  %v599_v34 = vsel %vm590_vm0, %v597_v23, %v598_v26  ;;  %v396_v35 = vor.u32 %v395_v28, %v391_v25  ;;  %v410_v41 = vshll.u32 %v2060_v33, 16  ;;  %v2253_v16 = vld [vmem:[%s2144_s17 + $0x48] sm:$0xff]   ;;  %v2066_v18 = vld [vmem:[%s2144_s17 + $0x50] ss:$0 sps:$4 sm:$0x11]   ;;  %v2266_v25 = vld [vmem:[%s2144_s17 + $0x54] sm:$0xff]  }
  0x1a   : > { %558 = vrot.lane.b32.xlu0 %v377_v31, %s2105_s21  ;;  %v389_v32 = vsel %vm365_vm1, %v384_v27, %v388_v24  ;;  %v400_v36 = vrot.slane %v398_v29, 1  ;;  %v407_v40 = vrot.slane %v405_v37, 1  ;;  %v600_v48 = vrot.slane %v2176_v30, 1  ;;  %v2068_v29 = vld [vmem:[%s2144_s17 + $0x5c] ss:$0 sps:$4 sm:$0x11]  }
  0x1b   : > { %641 = vrot.lane.b32.xlu1 %v596_v11, %s2104_s20  ;;  %v412_v43 = vrot.slane %v410_v41, 1  ;;  %v601_v49 = vrot.slane %v2060_v33, 1  ;;  %v417_v54 = vshll.u32 %v2209_v50, 16  ;;  %v415_v56 = vshrl.u32 %v2209_v50, 16  ;;  %v2291_v41 = vld [vmem:[%s2144_s17 + $0x60] sm:$0xff]  }
  0x1c   : > { %v401_v38 = vsel %vm365_vm1, %v396_v35, %v400_v36  ;;  %v408_v42 = vor.u32 %v407_v40, %v403_v39  ;;  %v422_v58 = vshll.u32 %v2062_v53, 16  ;;  %v603_v2 = vrot.slane %v2209_v50, 1  ;;  %v2072_v55 = vld [vmem:[%s2144_s17 + $0x74] ss:$0 sps:$4 sm:$0x11]  }
  0x1d   : > { %v602_v52 = vsel %vm590_vm0, %v600_v48, %v601_v49  ;;  %v419_v57 = vrot.slane %v417_v54, 1  ;;  %v604_v4 = vrot.slane %v2062_v53, 1  ;;  %v429_v6 = vshll.u32 %v2228_v62, 16 }
  0x1e   : > { %560 = vrot.lane.b32.xlu0 %v389_v32, %s2105_s21  ;;  %v413_v46 = vsel %vm365_vm1, %v408_v42, %v412_v43  ;;  %v424_v61 = vrot.slane %v422_v58, 1  ;;  %v427_v8 = vshrl.u32 %v2228_v62, 16  ;;  %v434_v10 = vshll.u32 %v2064_v5, 16  ;;  %v2070_v43 = vld [vmem:[%s2144_s17 + $0x68] ss:$0 sps:$4 sm:$0x11]  }
  0x1f   : > { %760 = vrot.lane.b32.xlu1 %v599_v34, %s2103_s19  ;;  %v420_v60 = vor.u32 %v419_v57, %v415_v56  ;;  %v605_v7 = vsel %vm590_vm0, %v603_v2, %v604_v4  ;;  %v431_v9 = vrot.slane %v429_v6, 1  ;;  %v606_v14 = vrot.slane %v2228_v62, 1 }
  0x20   : > { %v436_v12 = vrot.slane %v434_v10, 1  ;;  %v607_v15 = vrot.slane %v2064_v5, 1  ;;  %v441_v19 = vshll.u32 %v2253_v16, 16  ;;  %v439_v20 = vshrl.u32 %v2253_v16, 16 }
  0x21   : > { %v425_v63 = vsel %vm365_vm1, %v420_v60, %v424_v61  ;;  %v432_v11 = vor.u32 %v431_v9, %v427_v8  ;;  %v446_v22 = vshll.u32 %v2066_v18, 16  ;;  %v609_v27 = vrot.slane %v2253_v16, 1 }
  0x22   : > { %723 = vrot.lane.b32.xlu0 %v389_v32, %s2106_s22  ;;  %v608_v17 = vsel %vm590_vm0, %v606_v14, %v607_v15  ;;  %v443_v21 = vrot.slane %v441_v19, 1  ;;  %v610_v28 = vrot.slane %v2066_v18, 1  ;;  %v453_v31 = vshll.u32 %v2266_v25, 16  ;;  %v2078_v15 = vld [vmem:[%s2144_s17 + $0x80] ss:$0 sps:$4 sm:$0x11]  }
  0x23   : > { %725 = vrot.lane.b32.xlu1 %v401_v38, %s2106_s22  ;;  %v437_v13 = vsel %vm365_vm1, %v432_v11, %v436_v12  ;;  %v448_v24 = vrot.slane %v446_v22, 1  ;;  %v451_v33 = vshrl.u32 %v2266_v25, 16  ;;  %v458_v35 = vshll.u32 %v2068_v29, 16  ;;  %v2329_v11 = vld [vmem:[%s2144_s17 + $0x78] sm:$0xff]  }
  0x24   : > { %v444_v23 = vor.u32 %v443_v21, %v439_v20  ;;  %v611_v32 = vsel %vm590_vm0, %v609_v27, %v610_v28  ;;  %v612_v39 = vrot.slane %v2266_v25, 1  ;;  %v613_v40 = vrot.slane %v2068_v29, 1 }
  0x25   : > { %v460_v37 = vrot.slane %v458_v35, 1  ;;  %v465_v44 = vshll.u32 %v2291_v41, 16  ;;  %v463_v45 = vshrl.u32 %v2291_v41, 16  ;;  %v470_v47 = vshll.u32 %v2070_v43, 16 }
  0x26   : > { %795 = vrot.lane.b32.xlu0 %v2147_v0, %s2107_s25  ;;  %v449_v26 = vsel %vm365_vm1, %v444_v23, %v448_v24  ;;  %v614_v42 = vsel %vm590_vm0, %v612_v39, %v613_v40  ;;  %v615_v53 = vrot.slane %v2291_v41, 1  ;;  %v616_v54 = vrot.slane %v2070_v43, 1  ;;  %v2081_v40 = vld [vmem:[%s2144_s17 + $0x8c] ss:$0 sps:$4 sm:$0x11]  }
  0x27   : > { %797 = vrot.lane.b32.xlu1 %v2176_v30, %s2107_s25  ;;  %v472_v49 = vrot.slane %v470_v47, 1  ;;  %v477_v56 = vshll.u32 %v2304_v51, 16  ;;  %v475_v58 = vshrl.u32 %v2304_v51, 16  ;;  %v482_v60 = vshll.u32 %v2072_v55, 16 }
  0x28   : > { %v617_v57 = vsel %vm590_vm0, %v615_v53, %v616_v54  ;;  %v618_v8 = vrot.slane %v2304_v51, 1  ;;  %v619_v9 = vrot.slane %v2072_v55, 1  ;;  %v487_v21 = vshrl.u32 %v2329_v11, 16 }
  0x29   : > { %v479_v59 = vrot.slane %v477_v56, 1  ;;  %v484_v4 = vrot.slane %v482_v60, 1  ;;  %v494_v23 = vshll.u32 %v2078_v15, 16  ;;  %v621_v35 = vrot.slane %v2329_v11, 1 }
  0x2a   : > { %842 = vrot.lane.b32.xlu0 %v401_v38, %s2108_s30  ;;  %v506_v54 = vshll.u32 %v2081_v40, 16 }
  0x2b   : > { %844 = vrot.lane.b32.xlu1 %v413_v46, %s2108_s30  ;;  %v480_v2 = vor.u32 %v479_v59, %v475_v58 }
  0x2d   : > { %v485_v6 = vsel %vm365_vm1, %v480_v2, %v484_v4 }
  0x2e   : > { %877 = vrot.lane.b32.xlu0 %v599_v34, %s2109_s6 }
  0x2f   : > { %562 = vrot.lane.b32.xlu1 %v401_v38, %s2105_s21 }
  0x32   : > { %879 = vrot.lane.b32.xlu0 %v602_v52, %s2109_s6 }
  0x33   : > { %564 = vrot.lane.b32.xlu1 %v413_v46, %s2105_s21 }
  0x36   : > { %643 = vrot.lane.b32.xlu0 %v599_v34, %s2104_s20  ;;  %v455_v34 = vrot.slane %v453_v31, 1  ;;  %v2347_v31 = vld [vmem:[%s2144_s17 + $0x84] sm:$0xff]  }
  0x37   : > { %645 = vrot.lane.b32.xlu1 %v602_v52, %s2104_s20 }
  0x38   : > { %v456_v36 = vor.u32 %v455_v34, %v451_v33 }
  0x3a   : > { %680 = vrot.lane.b32.xlu0 %v2176_v30, %s2102_s18  ;;  %v461_v38 = vsel %vm365_vm1, %v456_v36, %v460_v37  ;;  %v622_v36 = vrot.slane %v2078_v15, 1 }
  0x3b   : > { %682 = vrot.lane.b32.xlu1 %v2209_v50, %s2102_s18 }
  0x3c   : > { %v623_v47 = vsel %vm590_vm0, %v621_v35, %v622_v36 }
  0x3e   : > { %727 = vrot.lane.b32.xlu0 %v413_v46, %s2106_s22  ;;  %v467_v46 = vrot.slane %v465_v44, 1 }
  0x3f   : > { %729 = vrot.lane.b32.xlu1 %v425_v63, %s2106_s22 }
  0x40   : > { %v468_v48 = vor.u32 %v467_v46, %v463_v45 }
  0x42   : > { %762 = vrot.lane.b32.xlu0 %v602_v52, %s2103_s19  ;;  %v473_v52 = vsel %vm365_vm1, %v468_v48, %v472_v49 }
  0x43   : > { %764 = vrot.lane.b32.xlu1 %v605_v7, %s2103_s19 }
  0x46   : > { %799 = vrot.lane.b32.xlu0 %v2209_v50, %s2107_s25 }
  0x47   : > { %801 = vrot.lane.b32.xlu1 %v2228_v62, %s2107_s25 }
  0x4a   : > { %846 = vrot.lane.b32.xlu0 %v425_v63, %s2108_s30 }
  0x4b   : > { %848 = vrot.lane.b32.xlu1 %v437_v13, %s2108_s30 }
  0x4e   : > { %881 = vrot.lane.b32.xlu0 %v605_v7, %s2109_s6 }
  0x4f   : > { %566 = vrot.lane.b32.xlu1 %v425_v63, %s2105_s21 }
  0x52   : > { %883 = vrot.lane.b32.xlu0 %v608_v17, %s2109_s6 }
  0x53   : > { %568 = vrot.lane.b32.xlu1 %v437_v13, %s2105_s21 }
  0x56   : > { %647 = vrot.lane.b32.xlu0 %v605_v7, %s2104_s20 }
  0x57   : > { %649 = vrot.lane.b32.xlu1 %v608_v17, %s2104_s20 }
  0x5a   : > { %684 = vrot.lane.b32.xlu0 %v2228_v62, %s2102_s18 }
  0x5b   : > { %686 = vrot.lane.b32.xlu1 %v2253_v16, %s2102_s18 }
  0x5e   : > { %731 = vrot.lane.b32.xlu0 %v437_v13, %s2106_s22  ;;  %v620_v13 = vsel %vm590_vm0, %v618_v8, %v619_v9  ;;  %v624_v8 = vrot.slane %v2347_v31, 1  ;;  %v625_v9 = vrot.slane %v2081_v40, 1 }
  0x5f   : > { %733 = vrot.lane.b32.xlu1 %v449_v26, %s2106_s22 }
  0x62   : > { %766 = vrot.lane.b32.xlu0 %v608_v17, %s2103_s19  ;;  %v489_v17 = vshll.u32 %v2329_v11, 16 }
  0x63   : > { %768 = vrot.lane.b32.xlu1 %v611_v32, %s2103_s19 }
  0x64   : > { %v491_v22 = vrot.slane %v489_v17, 1  ;;  %v2083_v17 = vld [vmem:[%s2144_s17 + $0x98] ss:$0 sps:$4 sm:$0x11]  }
  0x66   : > { %803 = vrot.lane.b32.xlu0 %v2253_v16, %s2107_s25  ;;  %v492_v29 = vor.u32 %v491_v22, %v487_v21 }
  0x67   : > { %805 = vrot.lane.b32.xlu1 %v2266_v25, %s2107_s25 }
  0x6a   : > { %850 = vrot.lane.b32.xlu0 %v449_v26, %s2108_s30 }
  0x6b   : > { %852 = vrot.lane.b32.xlu1 %v461_v38, %s2108_s30 }
  0x6e   : > { %885 = vrot.lane.b32.xlu0 %v611_v32, %s2109_s6 }
  0x6f   : > { %570 = vrot.lane.b32.xlu1 %v449_v26, %s2105_s21 }
  0x72   : > { %887 = vrot.lane.b32.xlu0 %v614_v42, %s2109_s6 }
  0x73   : > { %572 = vrot.lane.b32.xlu1 %v461_v38, %s2105_s21 }
  0x76   : > { %651 = vrot.lane.b32.xlu0 %v611_v32, %s2104_s20 }
  0x77   : > { %653 = vrot.lane.b32.xlu1 %v614_v42, %s2104_s20 }
  0x7a   : > { %688 = vrot.lane.b32.xlu0 %v2266_v25, %s2102_s18 }
  0x7b   : > { %690 = vrot.lane.b32.xlu1 %v2291_v41, %s2102_s18 }
  0x7e   : > { %735 = vrot.lane.b32.xlu0 %v461_v38, %s2106_s22 }
  0x7f   : > { %737 = vrot.lane.b32.xlu1 %v473_v52, %s2106_s22 }
  0x82   : > { %770 = vrot.lane.b32.xlu0 %v614_v42, %s2103_s19  ;;  %v501_v42 = vshll.u32 %v2347_v31, 16 }
  0x83   : > { %772 = vrot.lane.b32.xlu1 %v617_v57, %s2103_s19 }
  0x84   : > { %v679_v61 = vpop.permute.xlu1 %678  ;;  %v677_v63 = vpop.permute.xlu0 %676  ;;  %v503_v53 = vrot.slane %v501_v42, 1 }
  0x86   : > { %807 = vrot.lane.b32.xlu0 %v2291_v41, %s2107_s25 }
  0x87   : > { %809 = vrot.lane.b32.xlu1 %v2304_v51, %s2107_s25 }
  0x88   : > { %v759_v5 = vpop.permute.xlu0 %758 }
  0x89   : > { %v640_v7 = vpop.permute.xlu1 %639 }
  0x8a   : > { %854 = vrot.lane.b32.xlu0 %v473_v52, %s2108_s30 }
  0x8b   : > { %856 = vrot.lane.b32.xlu1 %v485_v6, %s2108_s30 }
  0x8c   : > { %v559_v10 = vpop.permute.xlu0 %558 }
  0x8d   : > { %v642_v12 = vpop.permute.xlu1 %641  ;;  %v911_v19 = vsel %vm909_vm3, %v2156_v3, %v559_v10  ;;  %v496_v3 = vrot.slane %v494_v23, 1  ;;  %v518_v23 = vshll.u32 %v2083_v17, 16 }
  0x8e   : > { %889 = vrot.lane.b32.xlu0 %v617_v57, %s2109_s6  ;;  %v944_v27 = vsel %vm942_vm4, %v911_v19, %v640_v7 }
  0x8f   : > { %574 = vrot.lane.b32.xlu1 %v473_v52, %s2105_s21  ;;  %v977_v34 = vsel %vm975_vm5, %v944_v27, %v677_v63  ;;  %v497_v39 = vsel %vm365_vm1, %v492_v29, %v496_v3  ;;  %v499_v52 = vshrl.u32 %v2347_v31, 16  ;;  %v508_v63 = vrot.slane %v506_v54, 1  ;;  %v2400_v29 = vld [vmem:[%s2144_s17 + $0x9c] sm:$0xff]  }
  0x90   : > { %v561_v14 = vpop.permute.xlu0 %560 }
  0x91   : > { %v761_v18 = vpop.permute.xlu1 %760  ;;  %v913_v26 = vsel %vm909_vm3, %v2150_v1, %v561_v14  ;;  %v626_v14 = vsel %vm590_vm0, %v624_v8, %v625_v9  ;;  %v630_v8 = vrot.slane %v2400_v29, 1 }
  0x92   : > { %891 = vrot.lane.b32.xlu0 %v620_v13, %s2109_s6  ;;  %v946_v32 = vsel %vm942_vm4, %v913_v26, %v642_v12  ;;  %v2387_v12 = vld [vmem:[%s2144_s17 + $0x90] sm:$0xff]  }
  0x93   : > { %576 = vrot.lane.b32.xlu1 %v485_v6, %s2105_s21  ;;  %v979_v37 = vsel %vm975_vm5, %v946_v32, %v679_v61  ;;  %v504_v61 = vor.u32 %v503_v53, %v499_v52  ;;  %v511_v21 = vshrl.u32 %v2387_v12, 16 }
  0x94   : > { %v724_v20 = vpop.permute.xlu0 %723 }
  0x95   : > { %v726_v24 = vpop.permute.xlu1 %725  ;;  %v1010_v1 = vsel %vm1008_vm6, %v977_v34, %v724_v20  ;;  %v627_v34 = vrot.slane %v2387_v12, 1 }
  0x96   : > { %655 = vrot.lane.b32.xlu0 %v617_v57, %s2104_s20  ;;  %v1043_v44 = vsel %vm1041_vm7, %v1010_v1, %v759_v5  ;;  %v1012_v45 = vsel %vm1008_vm6, %v979_v37, %v726_v24  ;;  %v628_v1 = vrot.slane %v2083_v17, 1 }
  0x97   : > { %657 = vrot.lane.b32.xlu1 %v620_v13, %s2104_s20  ;;  %v1045_v57 = vsel %vm1041_vm7, %v1012_v45, %v761_v18  ;;  %v513_v18 = vshll.u32 %v2387_v12, 16 }
  0x98   : > { %v796_v28 = vpop.permute.xlu0 %795 }
  0x99   : > { %v798_v33 = vpop.permute.xlu1 %797  ;;  %v1076_v46 = vsel %vm1074_vm8, %v1043_v44, %v796_v28  ;;  %v515_v22 = vrot.slane %v513_v18, 1  ;;  %v520_v28 = vrot.slane %v518_v23, 1  ;;  %v2087_v18 = vld [vmem:[%s2144_s17 + $0xb0] ss:$0 sps:$4 sm:$0x11]  }
  0x9a   : > { %692 = vrot.lane.b32.xlu0 %v2304_v51, %s2102_s18  ;;  %v1078_v58 = vsel %vm1074_vm8, %v1045_v57, %v798_v33 }
  0x9b   : > { %694 = vrot.lane.b32.xlu1 %v2329_v11, %s2102_s18  ;;  %v516_v27 = vor.u32 %v515_v22, %v511_v21 }
  0x9c   : > { %v843_v38 = vpop.permute.xlu0 %842 }
  0x9d   : > { %v845_v43 = vpop.permute.xlu1 %844  ;;  %v1109_v48 = vsel %vm1107_vm9, %v1076_v46, %v843_v38  ;;  %v521_v37 = vsel %vm365_vm1, %v516_v27, %v520_v28  ;;  %v2085_v38 = vld [vmem:[%s2144_s17 + $0xa4] ss:$0 sps:$4 sm:$0x11]   ;;  %v629_v46 = vsel %vm590_vm0, %v627_v34, %v628_v1 }
  0x9e   : > { %739 = vrot.lane.b32.xlu0 %v485_v6, %s2106_s22  ;;  %v1111_v59 = vsel %vm1107_vm9, %v1078_v58, %v845_v43  ;;  %v509_v6 = vsel %vm365_vm1, %v504_v61, %v508_v63  ;;  %v530_v53 = vshll.u32 %v2085_v38, 16  ;;  %v631_v9 = vrot.slane %v2085_v38, 1 }
  0x9f   : > { %741 = vrot.lane.b32.xlu1 %v497_v39, %s2106_s22 }
  0xa0   : > { %v878_v49 = vpop.permute.xlu0 %877  ;;  %v532_v63 = vrot.slane %v530_v53, 1 }
  0xa1   : > { %v563_v55 = vpop.permute.xlu1 %562  ;;  %v1142_v56 = vsel %vm1140_vm10, %v1109_v48, %v878_v49 }
  0xa2   : > { %774 = vrot.lane.b32.xlu0 %v620_v13, %s2103_s19  ;;  %1992 = vmatprep.mubr.msk.bf16.mxu0 %vm1209_vm11, %v1142_v56  ;;  %v915_v32 = vsel %vm909_vm3, %v2147_v0, %v563_v55 }
  0xa3   : > { %776 = vrot.lane.b32.xlu1 %v623_v47, %s2103_s19 }
  0xa4   : > { %v880_v60 = vpop.permute.xlu0 %879 }
  0xa5   : > { %v565_v2 = vpop.permute.xlu1 %564  ;;  %v1144_v4 = vsel %vm1140_vm10, %v1111_v59, %v880_v60 }
  0xa6   : > { %811 = vrot.lane.b32.xlu0 %v2329_v11, %s2107_s25  ;;  %1993 = vmatmul.mubr.msk.bf16.vlgmr.msra.gmra.mrb[0].mxu0 %vm1209_vm11, %v1144_v4  ;;  %v917_v42 = vsel %vm909_vm3, %v2176_v30, %v565_v2 }
  0xa7   : > { %813 = vrot.lane.b32.xlu1 %v2347_v31, %s2107_s25 }
  0xa8   : > { %v644_v5 = vpop.permute.xlu0 %643 }
  0xa9   : > { %v646_v7 = vpop.permute.xlu1 %645  ;;  %v948_v33 = vsel %vm942_vm4, %v915_v32, %v644_v5  ;;  %v2458_v32 = vld [vmem:[%s2144_s17 + $0xb4] sm:$0xff]  }
  0xaa   : > { %858 = vrot.lane.b32.xlu0 %v497_v39, %s2108_s30  ;;  %v950_v44 = vsel %vm942_vm4, %v917_v42, %v646_v7 }
  0xab   : > { %860 = vrot.lane.b32.xlu1 %v509_v6, %s2108_s30 }
  0xac   : > { %v681_v10 = vpop.permute.xlu0 %680 }
  0xad   : > { %v683_v13 = vpop.permute.xlu1 %682  ;;  %v981_v35 = vsel %vm975_vm5, %v948_v33, %v681_v10 }
  0xae   : > { %893 = vrot.lane.b32.xlu0 %v623_v47, %s2109_s6  ;;  %v983_v48 = vsel %vm975_vm5, %v950_v44, %v683_v13  ;;  %v2445_v13 = vld [vmem:[%s2144_s17 + $0xa8] sm:$0xff]  }
  0xaf   : > { %578 = vrot.lane.b32.xlu1 %v497_v39, %s2105_s21  ;;  %v525_v39 = vshll.u32 %v2400_v29, 16  ;;  %v535_v22 = vshrl.u32 %v2445_v13, 16 }
  0xb0   : > { %v728_v15 = vpop.permute.xlu0 %727 }
  0xb1   : > { %v730_v19 = vpop.permute.xlu1 %729  ;;  %v1014_v0 = vsel %vm1008_vm6, %v981_v35, %v728_v15  ;;  %v527_v30 = vrot.slane %v525_v39, 1  ;;  %v632_v15 = vsel %vm590_vm0, %v630_v8, %v631_v9  ;;  %v633_v35 = vrot.slane %v2445_v13, 1 }
  0xb2   : > { %895 = vrot.lane.b32.xlu0 %v626_v14, %s2109_s6  ;;  %v1016_v54 = vsel %vm1008_vm6, %v983_v48, %v730_v19  ;;  %v537_v19 = vshll.u32 %v2445_v13, 16  ;;  %v547_v48 = vshrl.u32 %v2458_v32, 16  ;;  %v636_v8 = vrot.slane %v2458_v32, 1 }
  0xb3   : > { %580 = vrot.lane.b32.xlu1 %v509_v6, %s2105_s21 }
  0xb4   : > { %v763_v20 = vpop.permute.xlu0 %762  ;;  %v539_v23 = vrot.slane %v537_v19, 1  ;;  %v2091_v19 = vld [vmem:[%s2144_s17 + $0xc8] ss:$0 sps:$4 sm:$0x11]  }
  0xb5   : > { %v765_v24 = vpop.permute.xlu1 %764  ;;  %v1047_v43 = vsel %vm1041_vm7, %v1014_v0, %v763_v20  ;;  %v2089_v0 = vld [vmem:[%s2144_s17 + $0xbc] ss:$0 sps:$4 sm:$0x11]  }
  0xb6   : > { %659 = vrot.lane.b32.xlu0 %v623_v47, %s2104_s20  ;;  %v523_v47 = vshrl.u32 %v2400_v29, 16  ;;  %v1049_v57 = vsel %vm1041_vm7, %v1016_v54, %v765_v24  ;;  %v542_v24 = vshll.u32 %v2087_v18, 16  ;;  %v540_v28 = vor.u32 %v539_v23, %v535_v22 }
  0xb7   : > { %661 = vrot.lane.b32.xlu1 %v626_v14, %s2104_s20  ;;  %v554_v53 = vshll.u32 %v2089_v0, 16  ;;  %v637_v9 = vrot.slane %v2089_v0, 1 }
  0xb8   : > { %v800_v26 = vpop.permute.xlu0 %799  ;;  %v528_v61 = vor.u32 %v527_v30, %v523_v47 }
  0xb9   : > { %v802_v3 = vpop.permute.xlu1 %801  ;;  %v1080_v45 = vsel %vm1074_vm8, %v1047_v43, %v800_v26 }
  0xba   : > { %696 = vrot.lane.b32.xlu0 %v2347_v31, %s2102_s18  ;;  %v1082_v58 = vsel %vm1074_vm8, %v1049_v57, %v802_v3  ;;  %v544_v3 = vrot.slane %v542_v24, 1 }
  0xbb   : > { %698 = vrot.lane.b32.xlu1 %v2387_v12, %s2102_s18 }
  0xbc   : > { %v847_v36 = vpop.permute.xlu0 %846  ;;  %v545_v39 = vsel %vm365_vm1, %v540_v28, %v544_v3 }
  0xbd   : > { %v849_v40 = vpop.permute.xlu1 %848  ;;  %v1113_v49 = vsel %vm1107_vm9, %v1080_v45, %v847_v36  ;;  %v634_v36 = vrot.slane %v2087_v18, 1 }
  0xbe   : > { %743 = vrot.lane.b32.xlu0 %v509_v6, %s2106_s22  ;;  %v1115_v59 = vsel %vm1107_vm9, %v1082_v58, %v849_v40  ;;  %v533_v6 = vsel %vm365_vm1, %v528_v61, %v532_v63  ;;  %v549_v40 = vshll.u32 %v2458_v32, 16  ;;  %v556_v63 = vrot.slane %v554_v53, 1 }
  0xbf   : > { %745 = vrot.lane.b32.xlu1 %v521_v37, %s2106_s22  ;;  %v635_v47 = vsel %vm590_vm0, %v633_v35, %v634_v36 }
  0xc0   : > { %v882_v52 = vpop.permute.xlu0 %881 }
  0xc1   : > { %v567_v55 = vpop.permute.xlu1 %566  ;;  %v1146_v56 = vsel %vm1140_vm10, %v1113_v49, %v882_v52 }
  0xc2   : > { %778 = vrot.lane.b32.xlu0 %v626_v14, %s2103_s19  ;;  %1996 = vmatprep.mubr.msk.bf16.mxu0 %vm1209_vm11, %v1146_v56  ;;  %v919_v34 = vsel %vm909_vm3, %v2209_v50, %v567_v55 }
  0xc3   : > { %780 = vrot.lane.b32.xlu1 %v629_v46, %s2103_s19 }
  0xc4   : > { %v884_v60 = vpop.permute.xlu0 %883 }
  0xc5   : > { %v569_v2 = vpop.permute.xlu1 %568  ;;  %v1148_v4 = vsel %vm1140_vm10, %v1115_v59, %v884_v60 }
  0xc6   : > { %815 = vrot.lane.b32.xlu0 %v2387_v12, %s2107_s25  ;;  %1997 = vmatmul.mubr.msk.bf16.gmra.mrb[4].mxu0 %vm1209_vm11, %v1148_v4  ;;  %v921_v43 = vsel %vm909_vm3, %v2228_v62, %v569_v2  ;;  %v551_v62 = vrot.slane %v549_v40, 1 }
  0xc7   : > { %817 = vrot.lane.b32.xlu1 %v2400_v29, %s2107_s25 }
  0xc8   : > { %v648_v5 = vpop.permute.xlu0 %647  ;;  %v552_v61 = vor.u32 %v551_v62, %v547_v48 }
  0xc9   : > { %v650_v7 = vpop.permute.xlu1 %649  ;;  %v952_v1 = vsel %vm942_vm4, %v919_v34, %v648_v5  ;;  %v2092_v34 = vld [vmem:[%s2144_s17 + $0xcc] sm:$0xff]  }
  0xca   : > { %862 = vrot.lane.b32.xlu0 %v521_v37, %s2108_s30  ;;  %v954_v45 = vsel %vm942_vm4, %v921_v43, %v650_v7 }
  0xcb   : > { %864 = vrot.lane.b32.xlu1 %v533_v6, %s2108_s30 }
  0xcc   : > { %v685_v10 = vpop.permute.xlu0 %684 }
  0xcd   : > { %v687_v14 = vpop.permute.xlu1 %686 }
  0xce   : > { %897 = vrot.lane.b32.xlu0 %v629_v46, %s2109_s6  ;;  %v987_v49 = vsel %vm975_vm5, %v954_v45, %v687_v14  ;;  %v2503_v14 = vld [vmem:[%s2144_s17 + $0xc0] sm:$0xff]  }
  0xcf   : > { %582 = vrot.lane.b32.xlu1 %v521_v37, %s2105_s21  ;;  %v985_v37 = vsel %vm975_vm5, %v952_v1, %v685_v10  ;;  %v712_v23 = vshrl.u32 %v2503_v14, 16 }
  0xd0   : > { %v732_v17 = vpop.permute.xlu0 %731 }
  0xd1   : > { %v734_v20 = vpop.permute.xlu1 %733  ;;  %v1018_v50 = vsel %vm1008_vm6, %v985_v37, %v732_v17  ;;  %v638_v17 = vsel %vm590_vm0, %v636_v8, %v637_v9  ;;  %v755_v37 = vrot.slane %v2503_v14, 1 }
  0xd2   : > { %899 = vrot.lane.b32.xlu0 %v632_v15, %s2109_s6  ;;  %v1020_v54 = vsel %vm1008_vm6, %v987_v49, %v734_v20  ;;  %v714_v20 = vshll.u32 %v2503_v14, 16  ;;  %v831_v49 = vshrl.u32 %v2092_v34, 16 }
  0xd3   : > { %584 = vrot.lane.b32.xlu1 %v533_v6, %s2105_s21 }
  0xd4   : > { %v767_v21 = vpop.permute.xlu0 %766  ;;  %v716_v24 = vrot.slane %v714_v20, 1 }
  0xd5   : > { %v769_v26 = vpop.permute.xlu1 %768  ;;  %v1051_v44 = vsel %vm1041_vm7, %v1018_v50, %v767_v21  ;;  %v2093_v50 = vld [vmem:[%s2144_s17 + $0xd4] ss:$0 sps:$4 sm:$0x11]  }
  0xd6   : > { %663 = vrot.lane.b32.xlu0 %v629_v46, %s2104_s20  ;;  %v1053_v57 = vsel %vm1041_vm7, %v1020_v54, %v769_v26  ;;  %v719_v26 = vshll.u32 %v2091_v19, 16  ;;  %v717_v3 = vor.u32 %v716_v24, %v712_v23  ;;  %v875_v8 = vrot.slane %v2093_v50, 1 }
  0xd7   : > { %665 = vrot.lane.b32.xlu1 %v632_v15, %s2104_s20 }
  0xd8   : > { %v804_v27 = vpop.permute.xlu0 %803 }
  0xd9   : > { %v806_v33 = vpop.permute.xlu1 %805  ;;  %v1084_v46 = vsel %vm1074_vm8, %v1051_v44, %v804_v27 }
  0xda   : > { %700 = vrot.lane.b32.xlu0 %v2400_v29, %s2102_s18  ;;  %v1086_v58 = vsel %vm1074_vm8, %v1053_v57, %v806_v33  ;;  %v721_v33 = vrot.slane %v719_v26, 1 }
  0xdb   : > { %702 = vrot.lane.b32.xlu1 %v2445_v13, %s2102_s18 }
  0xdc   : > { %v851_v38 = vpop.permute.xlu0 %850  ;;  %v722_v40 = vsel %vm365_vm1, %v717_v3, %v721_v33 }
  0xdd   : > { %v853_v42 = vpop.permute.xlu1 %852  ;;  %v1117_v52 = vsel %vm1107_vm9, %v1084_v46, %v851_v38  ;;  %v756_v38 = vrot.slane %v2091_v19, 1 }
  0xde   : > { %747 = vrot.lane.b32.xlu0 %v533_v6, %s2106_s22  ;;  %v1119_v59 = vsel %vm1107_vm9, %v1086_v58, %v853_v42  ;;  %v557_v6 = vsel %vm365_vm1, %v552_v61, %v556_v63  ;;  %v833_v42 = vshll.u32 %v2092_v34, 16 }
  0xdf   : > { %749 = vrot.lane.b32.xlu1 %v545_v39, %s2106_s22  ;;  %v757_v48 = vsel %vm590_vm0, %v755_v37, %v756_v38 }
  0xe0   : > { %v886_v30 = vpop.permute.xlu0 %885  ;;  %v835_v53 = vrot.slane %v833_v42, 1 }
  0xe1   : > { %v571_v55 = vpop.permute.xlu1 %570  ;;  %v1150_v56 = vsel %vm1140_vm10, %v1117_v52, %v886_v30 }
  0xe2   : > { %782 = vrot.lane.b32.xlu0 %v632_v15, %s2103_s19  ;;  %2000 = vmatprep.mubr.msk.bf16.mxu0 %vm1209_vm11, %v1150_v56  ;;  %v923_v35 = vsel %vm909_vm3, %v2253_v16, %v571_v55  ;;  %v836_v61 = vor.u32 %v835_v53, %v831_v49 }
  0xe3   : > { %784 = vrot.lane.b32.xlu1 %v635_v47, %s2103_s19 }
  0xe4   : > { %v888_v60 = vpop.permute.xlu0 %887 }
  0xe5   : > { %v573_v2 = vpop.permute.xlu1 %572  ;;  %v1152_v4 = vsel %vm1140_vm10, %v1119_v59, %v888_v60 }
  0xe6   : > { %819 = vrot.lane.b32.xlu0 %v2445_v13, %s2107_s25  ;;  %2001 = vmatmul.mubr.msk.bf16.gmra.mrb[8].mxu0 %vm1209_vm11, %v1152_v4  ;;  %v925_v44 = vsel %vm909_vm3, %v2266_v25, %v573_v2  ;;  %v838_v25 = vshll.u32 %v2093_v50, 16 }
  0xe7   : > { %821 = vrot.lane.b32.xlu1 %v2458_v32, %s2107_s25 }
  0xe8   : > { %v652_v5 = vpop.permute.xlu0 %651  ;;  %v840_v63 = vrot.slane %v838_v25, 1 }
  0xe9   : > { %v654_v7 = vpop.permute.xlu1 %653  ;;  %v956_v36 = vsel %vm942_vm4, %v923_v35, %v652_v5 }
  0xea   : > { %866 = vrot.lane.b32.xlu0 %v545_v39, %s2108_s30  ;;  %v958_v46 = vsel %vm942_vm4, %v925_v44, %v654_v7  ;;  %v874_v7 = vrot.slane %v2092_v34, 1 }
  0xeb   : > { %868 = vrot.lane.b32.xlu1 %v557_v6, %s2108_s30 }
  0xec   : > { %v689_v10 = vpop.permute.xlu0 %688 }
  0xed   : > { %v691_v15 = vpop.permute.xlu1 %690 }
  0xee   : > { %901 = vrot.lane.b32.xlu0 %v635_v47, %s2109_s6  ;;  %v991_v52 = vsel %vm975_vm5, %v958_v46, %v691_v15  ;;  %v876_v15 = vsel %vm590_vm0, %v874_v7, %v875_v8 }
  0xef   : > { %586 = vrot.lane.b32.xlu1 %v545_v39, %s2105_s21  ;;  %v989_v39 = vsel %vm975_vm5, %v956_v36, %v689_v10 }
  0xf0   : > { %v736_v18 = vpop.permute.xlu0 %735 }
  0xf1   : > { %v738_v21 = vpop.permute.xlu1 %737  ;;  %v1022_v16 = vsel %vm1008_vm6, %v989_v39, %v736_v18 }
  0xf2   : > { %903 = vrot.lane.b32.xlu0 %v638_v17, %s2109_s6  ;;  %v1024_v54 = vsel %vm1008_vm6, %v991_v52, %v738_v21 }
  0xf3   : > { %588 = vrot.lane.b32.xlu1 %v557_v6, %s2105_s21 }
  0xf4   : > { %v771_v22 = vpop.permute.xlu0 %770 }
  0xf5   : > { %v773_v27 = vpop.permute.xlu1 %772  ;;  %v1055_v45 = vsel %vm1041_vm7, %v1022_v16, %v771_v22 }
  0xf6   : > { %667 = vrot.lane.b32.xlu0 %v635_v47, %s2104_s20  ;;  %v1057_v57 = vsel %vm1041_vm7, %v1024_v54, %v773_v27 }
  0xf7   : > { %669 = vrot.lane.b32.xlu1 %v638_v17, %s2104_s20 }
  0xf8   : > { %v808_v28 = vpop.permute.xlu0 %807 }
  0xf9   : > { %v810_v1 = vpop.permute.xlu1 %809  ;;  %v1088_v47 = vsel %vm1074_vm8, %v1055_v45, %v808_v28 }
  0xfa   : > { %704 = vrot.lane.b32.xlu0 %v2458_v32, %s2102_s18  ;;  %v1090_v58 = vsel %vm1074_vm8, %v1057_v57, %v810_v1 }
  0xfb   : > { %706 = vrot.lane.b32.xlu1 %v2503_v14, %s2102_s18  ;;  %s181_s18 = scalar_lea.vmem %s2781_s3, %s1836_s15 }
  0xfc   : > { %v855_v0 = vpop.permute.xlu0 %854 }
  0xfd   : > { %v857_v43 = vpop.permute.xlu1 %856  ;;  %v1121_v30 = vsel %vm1107_vm9, %v1088_v47, %v855_v0 }
  0xfe   : > { %751 = vrot.lane.b32.xlu0 %v557_v6, %s2106_s22  ;;  %v1123_v59 = vsel %vm1107_vm9, %v1090_v58, %v857_v43  ;;  %v841_v6 = vsel %vm365_vm1, %v836_v61, %v840_v63 }
  0xff   : > { %753 = vrot.lane.b32.xlu1 %v722_v40, %s2106_s22 }
 0x100   : > { %v890_v62 = vpop.permute.xlu0 %889 }
 0x101   : > { %v575_v55 = vpop.permute.xlu1 %574  ;;  %v1154_v56 = vsel %vm1140_vm10, %v1121_v30, %v890_v62 }
 0x102   : > { %786 = vrot.lane.b32.xlu0 %v638_v17, %s2103_s19  ;;  %2004 = vmatprep.mubr.msk.bf16.mxu0 %vm1209_vm11, %v1154_v56  ;;  %v927_v23 = vsel %vm909_vm3, %v2291_v41, %v575_v55 }
 0x103   : > { %788 = vrot.lane.b32.xlu1 %v757_v48, %s2103_s19 }
 0x104   : > { %v892_v60 = vpop.permute.xlu0 %891 }
 0x105   : > { %v577_v2 = vpop.permute.xlu1 %576  ;;  %v1156_v4 = vsel %vm1140_vm10, %v1123_v59, %v892_v60 }
 0x106   : > { %823 = vrot.lane.b32.xlu0 %v2503_v14, %s2107_s25  ;;  %2005 = vmatmul.mubr.msk.bf16.gmra.mrb[12].mxu0 %vm1209_vm11, %v1156_v4  ;;  %v929_v33 = vsel %vm909_vm3, %v2304_v51, %v577_v2 }
 0x107   : > { %825 = vrot.lane.b32.xlu1 %v2092_v34, %s2107_s25 }
 0x108   : > { %v656_v5 = vpop.permute.xlu0 %655 }
 0x109   : > { %v658_v9 = vpop.permute.xlu1 %657  ;;  %v960_v24 = vsel %vm942_vm4, %v927_v23, %v656_v5 }
 0x10a   : > { %870 = vrot.lane.b32.xlu0 %v722_v40, %s2108_s30  ;;  %v962_v1 = vsel %vm942_vm4, %v929_v33, %v658_v9 }
 0x10b   : > { %872 = vrot.lane.b32.xlu1 %v841_v6, %s2108_s30 }
 0x10c   : > { %v693_v10 = vpop.permute.xlu0 %692 }
 0x10d   : > { %v695_v17 = vpop.permute.xlu1 %694  ;;  %v993_v26 = vsel %vm975_vm5, %v960_v24, %v693_v10 }
 0x10e   : > { %905 = vrot.lane.b32.xlu0 %v757_v48, %s2109_s6  ;;  %v995_v36 = vsel %vm975_vm5, %v962_v1, %v695_v17 }
 0x10f   : > { %907 = vrot.lane.b32.xlu1 %v876_v15, %s2109_s6 }
 0x110   : > { %v740_v14 = vpop.permute.xlu0 %739 }
 0x111   : > { %v742_v18 = vpop.permute.xlu1 %741  ;;  %v1026_v28 = vsel %vm1008_vm6, %v993_v26, %v740_v14 }
 0x112   : > { %v1028_v38 = vsel %vm1008_vm6, %v995_v36, %v742_v18 }
 0x114   : > { %v775_v19 = vpop.permute.xlu0 %774 }
 0x115   : > { %v777_v20 = vpop.permute.xlu1 %776  ;;  %v1059_v34 = vsel %vm1041_vm7, %v1026_v28, %v775_v19 }
 0x116   : > { %v1061_v40 = vsel %vm1041_vm7, %v1028_v38, %v777_v20 }
 0x118   : > { %v812_v21 = vpop.permute.xlu0 %811 }
 0x119   : > { %v814_v22 = vpop.permute.xlu1 %813  ;;  %v1092_v35 = vsel %vm1074_vm8, %v1059_v34, %v812_v21 }
 0x11a   : > { %v1094_v51 = vsel %vm1074_vm8, %v1061_v40, %v814_v22 }
 0x11c   : > { %v859_v27 = vpop.permute.xlu0 %858 }
 0x11d   : > { %v861_v3 = vpop.permute.xlu1 %860  ;;  %v1125_v41 = vsel %vm1107_vm9, %v1092_v35, %v859_v27 }
 0x11e   : > { %v1127_v50 = vsel %vm1107_vm9, %v1094_v51, %v861_v3 }
 0x120   : > { %v894_v37 = vpop.permute.xlu0 %893 }
 0x121   : > { %v579_v39 = vpop.permute.xlu1 %578  ;;  %v1158_v0 = vsel %vm1140_vm10, %v1125_v41, %v894_v37 }
 0x122   : > { %2008 = vmatprep.mubr.msk.bf16.mxu1 %vm1209_vm11, %v1158_v0  ;;  %v931_v25 = vsel %vm909_vm3, %v2329_v11, %v579_v39 }
 0x124   : > { %v896_v42 = vpop.permute.xlu0 %895 }
 0x125   : > { %v581_v16 = vpop.permute.xlu1 %580  ;;  %v1160_v43 = vsel %vm1140_vm10, %v1127_v50, %v896_v42 }
 0x126   : > { %2009 = vmatmul.mubr.msk.bf16.vlgmr.msra.gmra.mrb[0].mxu1 %vm1209_vm11, %v1160_v43  ;;  %v933_v59 = vsel %vm909_vm3, %v2347_v31, %v581_v16 }
 0x128   : > { %v660_v44 = vpop.permute.xlu0 %659 }
 0x129   : > { %v662_v45 = vpop.permute.xlu1 %661  ;;  %v964_v54 = vsel %vm942_vm4, %v931_v25, %v660_v44 }
 0x12a   : > { %v966_v61 = vsel %vm942_vm4, %v933_v59, %v662_v45 }
 0x12c   : > { %v697_v46 = vpop.permute.xlu0 %696 }
 0x12d   : > { %v699_v47 = vpop.permute.xlu1 %698  ;;  %v997_v55 = vsel %vm975_vm5, %v964_v54, %v697_v46 }
 0x12e   : > { %v999_v2 = vsel %vm975_vm5, %v966_v61, %v699_v47 }
 0x130   : > { %v744_v48 = vpop.permute.xlu0 %743 }
 0x131   : > { %v746_v49 = vpop.permute.xlu1 %745  ;;  %v1030_v57 = vsel %vm1008_vm6, %v997_v55, %v744_v48 }
 0x132   : > { %v1032_v5 = vsel %vm1008_vm6, %v999_v2, %v746_v49 }
 0x134   : > { %v779_v52 = vpop.permute.xlu0 %778 }
 0x135   : > { %v781_v30 = vpop.permute.xlu1 %780  ;;  %v1063_v60 = vsel %vm1041_vm7, %v1030_v57, %v779_v52 }
 0x136   : > { %v1065_v8 = vsel %vm1041_vm7, %v1032_v5, %v781_v30 }
 0x138   : > { %v816_v62 = vpop.permute.xlu0 %815 }
 0x139   : > { %v818_v53 = vpop.permute.xlu1 %817  ;;  %v1096_v63 = vsel %vm1074_vm8, %v1063_v60, %v816_v62 }
 0x13a   : > { %v1098_v31 = vsel %vm1074_vm8, %v1065_v8, %v818_v53 }
 0x13c   : > { %v863_v56 = vpop.permute.xlu0 %862 }
 0x13d   : > { %v865_v58 = vpop.permute.xlu1 %864  ;;  %v1129_v11 = vsel %vm1107_vm9, %v1096_v63, %v863_v56 }
 0x13e   : > { %v1131_v9 = vsel %vm1107_vm9, %v1098_v31, %v865_v58 }
 0x140   : > { %v898_v4 = vpop.permute.xlu0 %897 }
 0x141   : > { %v583_v6 = vpop.permute.xlu1 %582  ;;  %v1162_v7 = vsel %vm1140_vm10, %v1129_v11, %v898_v4 }
 0x142   : > { %2012 = vmatprep.mubr.msk.bf16.mxu1 %vm1209_vm11, %v1162_v7  ;;  %v935_v28 = vsel %vm909_vm3, %v2387_v12, %v583_v6 }
 0x144   : > { %v900_v10 = vpop.permute.xlu0 %899 }
 0x145   : > { %v585_v15 = vpop.permute.xlu1 %584  ;;  %v1164_v17 = vsel %vm1140_vm10, %v1131_v9, %v900_v10 }
 0x146   : > { %2013 = vmatmul.mubr.msk.bf16.gmra.mrb[4].mxu1 %vm1209_vm11, %v1164_v17  ;;  %v937_v36 = vsel %vm909_vm3, %v2400_v29, %v585_v15 }
 0x148   : > { %v664_v14 = vpop.permute.xlu0 %663 }
 0x149   : > { %v666_v18 = vpop.permute.xlu1 %665  ;;  %v968_v3 = vsel %vm942_vm4, %v935_v28, %v664_v14 }
 0x14a   : > { %v970_v37 = vsel %vm942_vm4, %v937_v36, %v666_v18 }
 0x14c   : > { %v701_v19 = vpop.permute.xlu0 %700 }
 0x14d   : > { %v703_v20 = vpop.permute.xlu1 %702  ;;  %v1001_v33 = vsel %vm975_vm5, %v968_v3, %v701_v19 }
 0x14e   : > { %v1003_v39 = vsel %vm975_vm5, %v970_v37, %v703_v20 }
 0x150   : > { %v748_v21 = vpop.permute.xlu0 %747 }
 0x151   : > { %v750_v22 = vpop.permute.xlu1 %749  ;;  %v1034_v1 = vsel %vm1008_vm6, %v1001_v33, %v748_v21 }
 0x152   : > { %v1036_v40 = vsel %vm1008_vm6, %v1003_v39, %v750_v22 }
 0x154   : > { %v783_v23 = vpop.permute.xlu0 %782 }
 0x155   : > { %v785_v24 = vpop.permute.xlu1 %784  ;;  %v1067_v41 = vsel %vm1041_vm7, %v1034_v1, %v783_v23 }
 0x156   : > { %v1069_v42 = vsel %vm1041_vm7, %v1036_v40, %v785_v24 }
 0x158   : > { %v820_v26 = vpop.permute.xlu0 %819 }
 0x159   : > { %v822_v27 = vpop.permute.xlu1 %821  ;;  %v1100_v38 = vsel %vm1074_vm8, %v1067_v41, %v820_v26 }
 0x15a   : > { %v1102_v29 = vsel %vm1074_vm8, %v1069_v42, %v822_v27 }
 0x15c   : > { %v867_v34 = vpop.permute.xlu0 %866 }
 0x15d   : > { %v869_v35 = vpop.permute.xlu1 %868  ;;  %v1133_v12 = vsel %vm1107_vm9, %v1100_v38, %v867_v34 }
 0x15e   : > { %v1135_v16 = vsel %vm1107_vm9, %v1102_v29, %v869_v35 }
 0x160   : > { %v902_v0 = vpop.permute.xlu0 %901 }
 0x161   : > { %v587_v51 = vpop.permute.xlu1 %586  ;;  %v1166_v50 = vsel %vm1140_vm10, %v1133_v12, %v902_v0 }
 0x162   : > { %2016 = vmatprep.mubr.msk.bf16.mxu1 %vm1209_vm11, %v1166_v50  ;;  %v939_v25 = vsel %vm909_vm3, %v2445_v13, %v587_v51 }
 0x164   : > { %v904_v43 = vpop.permute.xlu0 %903 }
 0x165   : > { %v589_v44 = vpop.permute.xlu1 %588  ;;  %v1168_v45 = vsel %vm1140_vm10, %v1135_v16, %v904_v43 }
 0x166   : > { %2017 = vmatmul.mubr.msk.bf16.gmra.mrb[8].mxu1 %vm1209_vm11, %v1168_v45  ;;  %v941_v55 = vsel %vm909_vm3, %v2458_v32, %v589_v44 }
 0x168   : > { %v668_v46 = vpop.permute.xlu0 %667 }
 0x169   : > { %v670_v47 = vpop.permute.xlu1 %669  ;;  %v972_v56 = vsel %vm942_vm4, %v939_v25, %v668_v46 }
 0x16a   : > { %v974_v59 = vsel %vm942_vm4, %v941_v55, %v670_v47 }
 0x16c   : > { %v705_v48 = vpop.permute.xlu0 %704 }
 0x16d   : > { %v707_v49 = vpop.permute.xlu1 %706  ;;  %v1005_v60 = vsel %vm975_vm5, %v972_v56, %v705_v48 }
 0x16e   : > { %v1007_v32 = vsel %vm975_vm5, %v974_v59, %v707_v49 }
 0x170   : > { %v752_v52 = vpop.permute.xlu0 %751 }
 0x171   : > { %v754_v30 = vpop.permute.xlu1 %753  ;;  %v1038_v63 = vsel %vm1008_vm6, %v1005_v60, %v752_v52 }
 0x172   : > { %v1040_v5 = vsel %vm1008_vm6, %v1007_v32, %v754_v30 }
 0x174   : > { %v787_v62 = vpop.permute.xlu0 %786 }
 0x175   : > { %v789_v53 = vpop.permute.xlu1 %788  ;;  %v1071_v6 = vsel %vm1041_vm7, %v1038_v63, %v787_v62 }
 0x176   : > { %v1073_v19 = vsel %vm1041_vm7, %v1040_v5, %v789_v53 }
 0x178   : > { %v824_v54 = vpop.permute.xlu0 %823 }
 0x179   : > { %v826_v57 = vpop.permute.xlu1 %825  ;;  %v1994_v58 = vpop.f32.mrb[0].mxu0  ;;  %v1104_v20 = vsel %vm1074_vm8, %v1071_v6, %v824_v54 }
 0x17a   : > { %v1931_v13 = vpack.c.bf16 %v1994_v58, %v1994_v58  ;;  %v1280_v61 = vpop.f32.mrb[1].mxu0  ;;  %v1478_v7 = vmul.f32 %v1994_v58, %v1994_v58  ;;  %v1410_v22 = vsel %vm909_vm3, %v1994_v58, 0.0  ;;  %v1106_v27 = vsel %vm1074_vm8, %v1073_v19, %v826_v57 }
 0x17b   : > { %v1476_v2 = vmul.f32 %v1280_v61, %v1280_v61  ;;  %v1929_v11 = vpack.c.bf16 %v1280_v61, %v1280_v61  ;;  %v1995_v4 = vpop.f32.mrb[2].mxu0  ;;  %v1407_v10 = vsel %vm909_vm3, %v1280_v61, 0.0 }
 0x17c   : > { %1712 = vst.msk [vmem:[%s2626_s14 + $0x8] sm:$0xf] %vm1709_vm12, %v1931_v13  ;;  %v1932_v8 = vpack.c.bf16 %v1995_v4, %v1995_v4  ;;  %v1283_v31 = vpop.f32.mrb[3].mxu0  ;;  %v871_v9 = vpop.permute.xlu0 %870  ;;  %v1479_v24 = vmul.f32 %v1995_v4, %v1995_v4  ;;  %v1511_v1 = vsel %vm909_vm3, %v1478_v7, 0.0  ;;  %v1412_v35 = vsel %vm909_vm3, %v1995_v4, 0.0 }
 0x17d   : > { %1710 = vst.msk [vmem:[%s2626_s14] sm:$0xf] %vm1709_vm12, %v1929_v11  ;;  %v873_v15 = vpop.permute.xlu1 %872  ;;  %v1408_v17 = vsel %vm909_vm3, %v1283_v31, 0.0  ;;  %v1477_v14 = vmul.f32 %v1283_v31, %v1283_v31  ;;  %v1930_v18 = vpack.c.bf16 %v1283_v31, %v1283_v31  ;;  %v1508_v23 = vsel %vm909_vm3, %v1476_v2, 0.0 }
 0x17e   : > { %1713 = vst.msk [vmem:[%s2626_s14 + $0xc] sm:$0xf] %vm1709_vm12, %v1932_v8  ;;  %v1409_v21 = vadd.f32 %v1408_v17, %v1407_v10  ;;  %v1137_v33 = vsel %vm1107_vm9, %v1104_v20, %v871_v9  ;;  %v1139_v36 = vsel %vm1107_vm9, %v1106_v27, %v873_v15  ;;  %v1513_v0 = vsel %vm909_vm3, %v1479_v24, 0.0 }
 0x17f   : > { %v1509_v26 = vsel %vm909_vm3, %v1477_v14, 0.0  ;;  %1711 = vst.msk [vmem:[%s2626_s14 + $0x4] sm:$0xf] %vm1709_vm12, %v1930_v18 }
 0x180   : > { %v1411_v28 = vadd.f32 %v1410_v22, %v1409_v21  ;;  %v1510_v3 = vadd.f32 %v1509_v26, %v1508_v23  ;;  %v906_v34 = vpop.permute.xlu0 %905 }
 0x181   : > { %v908_v41 = vpop.permute.xlu1 %907  ;;  %v1170_v37 = vsel %vm1140_vm10, %v1137_v33, %v906_v34 }
 0x182   : > { %v1512_v38 = vadd.f32 %v1511_v1, %v1510_v3  ;;  %v1172_v39 = vsel %vm1140_vm10, %v1139_v36, %v908_v41  ;;  %2020 = vmatprep.mubr.msk.bf16.mxu1 %vm1209_vm11, %v1170_v37  ;;  %v1413_v12 = vadd.f32 %v1412_v35, %v1411_v28 }
 0x183   : > { %2021 = vmatmul.mubr.msk.bf16.gmra.mrb[12].mxu1 %vm1209_vm11, %v1172_v39 }
 0x184   : > { %v1514_v40 = vadd.f32 %v1513_v0, %v1512_v38 }
 0x199   : > { %v1998_v51 = vpop.f32.mrb[4].mxu0 }
 0x19a   : > { %v1935_v50 = vpack.c.bf16 %v1998_v51, %v1998_v51  ;;  %v1296_v42 = vpop.f32.mrb[5].mxu0  ;;  %v1482_v45 = vmul.f32 %v1998_v51, %v1998_v51  ;;  %v1418_v54 = vsel %vm909_vm3, %v1998_v51, 0.0 }
 0x19b   : > { %v1414_v29 = vsel %vm909_vm3, %v1296_v42, 0.0  ;;  %v1480_v16 = vmul.f32 %v1296_v42, %v1296_v42  ;;  %v1933_v43 = vpack.c.bf16 %v1296_v42, %v1296_v42  ;;  %v1999_v44 = vpop.f32.mrb[6].mxu0 }
 0x19c   : > { %1716 = vst.msk [vmem:[%s2626_s14 + $0x18] sm:$0xf] %vm1709_vm12, %v1935_v50  ;;  %v1415_v46 = vadd.f32 %v1414_v29, %v1413_v12  ;;  %v1299_v47 = vpop.f32.mrb[7].mxu0  ;;  %v1936_v49 = vpack.c.bf16 %v1999_v44, %v1999_v44  ;;  %v1483_v55 = vmul.f32 %v1999_v44, %v1999_v44  ;;  %v1519_v59 = vsel %vm909_vm3, %v1482_v45, 0.0 }
 0x19d   : > { %v1515_v48 = vsel %vm909_vm3, %v1480_v16, 0.0  ;;  %1714 = vst.msk [vmem:[%s2626_s14 + $0x10] sm:$0xf] %vm1709_vm12, %v1933_v43  ;;  %v1416_v52 = vsel %vm909_vm3, %v1299_v47, 0.0  ;;  %v1481_v30 = vmul.f32 %v1299_v47, %v1299_v47  ;;  %v1934_v25 = vpack.c.bf16 %v1299_v47, %v1299_v47 }
 0x19e   : > { %v1516_v62 = vadd.f32 %v1515_v48, %v1514_v40  ;;  %v1417_v53 = vadd.f32 %v1416_v52, %v1415_v46  ;;  %1717 = vst.msk [vmem:[%s2626_s14 + $0x1c] sm:$0xf] %vm1709_vm12, %v1936_v49  ;;  %v1420_v60 = vsel %vm909_vm3, %v1999_v44, 0.0  ;;  %v1521_v32 = vsel %vm909_vm3, %v1483_v55, 0.0 }
 0x19f   : > { %v1517_v56 = vsel %vm909_vm3, %v1481_v30, 0.0  ;;  %1715 = vst.msk [vmem:[%s2626_s14 + $0x14] sm:$0xf] %vm1709_vm12, %v1934_v25 }
 0x1a0   : > { %v1419_v57 = vadd.f32 %v1418_v54, %v1417_v53  ;;  %v1518_v58 = vadd.f32 %v1517_v56, %v1516_v62 }
 0x1a2   : > { %v1520_v13 = vadd.f32 %v1519_v59, %v1518_v58  ;;  %v1421_v61 = vadd.f32 %v1420_v60, %v1419_v57 }
 0x1a4   : > { %v1522_v63 = vadd.f32 %v1521_v32, %v1520_v13 }
 0x1b9   : > { %v2002_v2 = vpop.f32.mrb[8].mxu0 }
 0x1ba   : > { %v1939_v11 = vpack.c.bf16 %v2002_v2, %v2002_v2  ;;  %v1312_v4 = vpop.f32.mrb[9].mxu0  ;;  %v1486_v31 = vmul.f32 %v2002_v2, %v2002_v2  ;;  %v1426_v22 = vsel %vm909_vm3, %v2002_v2, 0.0 }
 0x1bb   : > { %v1422_v5 = vsel %vm909_vm3, %v1312_v4, 0.0  ;;  %v1484_v6 = vmul.f32 %v1312_v4, %v1312_v4  ;;  %v1937_v7 = vpack.c.bf16 %v1312_v4, %v1312_v4  ;;  %v2003_v8 = vpop.f32.mrb[10].mxu0 }
 0x1bc   : > { %1720 = vst.msk [vmem:[%s2626_s14 + $0x28] sm:$0xf] %vm1709_vm12, %v1939_v11  ;;  %v1423_v9 = vadd.f32 %v1422_v5, %v1421_v61  ;;  %v1315_v10 = vpop.f32.mrb[11].mxu0  ;;  %v1940_v17 = vpack.c.bf16 %v2003_v8, %v2003_v8  ;;  %v1487_v23 = vmul.f32 %v2003_v8, %v2003_v8  ;;  %v1527_v28 = vsel %vm909_vm3, %v1486_v31, 0.0 }
 0x1bd   : > { %v1523_v15 = vsel %vm909_vm3, %v1484_v6, 0.0  ;;  %1718 = vst.msk [vmem:[%s2626_s14 + $0x20] sm:$0xf] %vm1709_vm12, %v1937_v7  ;;  %v1424_v14 = vsel %vm909_vm3, %v1315_v10, 0.0  ;;  %v1485_v18 = vmul.f32 %v1315_v10, %v1315_v10  ;;  %v1938_v21 = vpack.c.bf16 %v1315_v10, %v1315_v10 }
 0x1be   : > { %v1524_v19 = vadd.f32 %v1523_v15, %v1522_v63  ;;  %v1425_v20 = vadd.f32 %v1424_v14, %v1423_v9  ;;  %1721 = vst.msk [vmem:[%s2626_s14 + $0x2c] sm:$0xf] %vm1709_vm12, %v1940_v17  ;;  %v1428_v3 = vsel %vm909_vm3, %v2003_v8, 0.0  ;;  %v1529_v1 = vsel %vm909_vm3, %v1487_v23, 0.0 }
 0x1bf   : > { %v1525_v24 = vsel %vm909_vm3, %v1485_v18, 0.0  ;;  %1719 = vst.msk [vmem:[%s2626_s14 + $0x24] sm:$0xf] %vm1709_vm12, %v1938_v21 }
 0x1c0   : > { %v1427_v26 = vadd.f32 %v1426_v22, %v1425_v20  ;;  %v1526_v27 = vadd.f32 %v1525_v24, %v1524_v19 }
 0x1c2   : > { %v1528_v33 = vadd.f32 %v1527_v28, %v1526_v27  ;;  %v1429_v34 = vadd.f32 %v1428_v3, %v1427_v26 }
 0x1c4   : > { %v1530_v35 = vadd.f32 %v1529_v1, %v1528_v33 }
 0x1d9   : > { %v2006_v36 = vpop.f32.mrb[12].mxu0 }
 0x1da   : > { %v1943_v41 = vpack.c.bf16 %v2006_v36, %v2006_v36  ;;  %v1328_v37 = vpop.f32.mrb[13].mxu0  ;;  %v1490_v40 = vmul.f32 %v2006_v36, %v2006_v36  ;;  %v1434_v47 = vsel %vm909_vm3, %v2006_v36, 0.0 }
 0x1db   : > { %v1430_v38 = vsel %vm909_vm3, %v1328_v37, 0.0  ;;  %v1488_v39 = vmul.f32 %v1328_v37, %v1328_v37  ;;  %v1941_v12 = vpack.c.bf16 %v1328_v37, %v1328_v37  ;;  %v2007_v0 = vpop.f32.mrb[14].mxu0 }
 0x1dc   : > { %1724 = vst.msk [vmem:[%s2626_s14 + $0x38] sm:$0xf] %vm1709_vm12, %v1943_v41  ;;  %v1431_v51 = vadd.f32 %v1430_v38, %v1429_v34  ;;  %v1331_v50 = vpop.f32.mrb[15].mxu0  ;;  %v1944_v29 = vpack.c.bf16 %v2007_v0, %v2007_v0  ;;  %v1491_v48 = vmul.f32 %v2007_v0, %v2007_v0  ;;  %v1535_v62 = vsel %vm909_vm3, %v1490_v40, 0.0 }
 0x1dd   : > { %v1531_v42 = vsel %vm909_vm3, %v1488_v39, 0.0  ;;  %1722 = vst.msk [vmem:[%s2626_s14 + $0x30] sm:$0xf] %vm1709_vm12, %v1941_v12  ;;  %v1432_v16 = vsel %vm909_vm3, %v1331_v50, 0.0  ;;  %v1489_v43 = vmul.f32 %v1331_v50, %v1331_v50  ;;  %v1942_v46 = vpack.c.bf16 %v1331_v50, %v1331_v50 }
 0x1de   : > { %v1532_v44 = vadd.f32 %v1531_v42, %v1530_v35  ;;  %v1433_v45 = vadd.f32 %v1432_v16, %v1431_v51  ;;  %1725 = vst.msk [vmem:[%s2626_s14 + $0x3c] sm:$0xf] %vm1709_vm12, %v1944_v29  ;;  %v1436_v53 = vsel %vm909_vm3, %v2007_v0, 0.0  ;;  %v1537_v55 = vsel %vm909_vm3, %v1491_v48, 0.0 }
 0x1df   : > { %v1533_v49 = vsel %vm909_vm3, %v1489_v43, 0.0  ;;  %1723 = vst.msk [vmem:[%s2626_s14 + $0x34] sm:$0xf] %vm1709_vm12, %v1942_v46 }
 0x1e0   : > { %v1435_v52 = vadd.f32 %v1434_v47, %v1433_v45  ;;  %v1534_v30 = vadd.f32 %v1533_v49, %v1532_v44 }
 0x1e2   : > { %v1536_v25 = vadd.f32 %v1535_v62, %v1534_v30  ;;  %v1437_v54 = vadd.f32 %v1436_v53, %v1435_v52 }
 0x1e4   : > { %v1538_v56 = vadd.f32 %v1537_v55, %v1536_v25 }
 0x1f9   : > { %v2010_v57 = vpop.f32.mrb[0].mxu1 }
 0x1fa   : > { %v1947_v58 = vpack.c.bf16 %v2010_v57, %v2010_v57  ;;  %v1344_v59 = vpop.f32.mrb[1].mxu1  ;;  %v1494_v63 = vmul.f32 %v2010_v57, %v2010_v57  ;;  %v1442_v10 = vsel %vm909_vm3, %v2010_v57, 0.0 }
 0x1fb   : > { %v1438_v60 = vsel %vm909_vm3, %v1344_v59, 0.0  ;;  %v1492_v13 = vmul.f32 %v1344_v59, %v1344_v59  ;;  %v1945_v61 = vpack.c.bf16 %v1344_v59, %v1344_v59  ;;  %v2011_v32 = vpop.f32.mrb[2].mxu1 }
 0x1fc   : > { %1728 = vst.msk [vmem:[%s2626_s14 + $0x48] sm:$0xf] %vm1709_vm12, %v1947_v58  ;;  %v1439_v2 = vadd.f32 %v1438_v60, %v1437_v54  ;;  %v1347_v11 = vpop.f32.mrb[3].mxu1  ;;  %v1948_v5 = vpack.c.bf16 %v2011_v32, %v2011_v32  ;;  %v1495_v15 = vmul.f32 %v2011_v32, %v2011_v32  ;;  %v1543_v19 = vsel %vm909_vm3, %v1494_v63, 0.0 }
 0x1fd   : > { %v1539_v4 = vsel %vm909_vm3, %v1492_v13, 0.0  ;;  %1726 = vst.msk [vmem:[%s2626_s14 + $0x40] sm:$0xf] %vm1709_vm12, %v1945_v61  ;;  %v1440_v6 = vsel %vm909_vm3, %v1347_v11, 0.0  ;;  %v1493_v7 = vmul.f32 %v1347_v11, %v1347_v11  ;;  %v1946_v9 = vpack.c.bf16 %v1347_v11, %v1347_v11 }
 0x1fe   : > { %v1540_v8 = vadd.f32 %v1539_v4, %v1538_v56  ;;  %v1441_v31 = vadd.f32 %v1440_v6, %v1439_v2  ;;  %1729 = vst.msk [vmem:[%s2626_s14 + $0x4c] sm:$0xf] %vm1709_vm12, %v1948_v5  ;;  %v1444_v20 = vsel %vm909_vm3, %v2011_v32, 0.0  ;;  %v1545_v23 = vsel %vm909_vm3, %v1495_v15, 0.0 }
 0x1ff   : > { %v1541_v17 = vsel %vm909_vm3, %v1493_v7, 0.0  ;;  %1727 = vst.msk [vmem:[%s2626_s14 + $0x44] sm:$0xf] %vm1709_vm12, %v1946_v9 }
 0x200   : > { %v1443_v14 = vadd.f32 %v1442_v10, %v1441_v31  ;;  %v1542_v18 = vadd.f32 %v1541_v17, %v1540_v8 }
 0x202   : > { %v1544_v21 = vadd.f32 %v1543_v19, %v1542_v18  ;;  %v1445_v22 = vadd.f32 %v1444_v20, %v1443_v14 }
 0x204   : > { %v1546_v24 = vadd.f32 %v1545_v23, %v1544_v21 }
 0x219   : > { %v2014_v26 = vpop.f32.mrb[4].mxu1 }
 0x21a   : > { %v1951_v27 = vpack.c.bf16 %v2014_v26, %v2014_v26  ;;  %v1360_v28 = vpop.f32.mrb[5].mxu1  ;;  %v1498_v35 = vmul.f32 %v2014_v26, %v2014_v26  ;;  %v1450_v50 = vsel %vm909_vm3, %v2014_v26, 0.0 }
 0x21b   : > { %v1446_v3 = vsel %vm909_vm3, %v1360_v28, 0.0  ;;  %v1496_v33 = vmul.f32 %v1360_v28, %v1360_v28  ;;  %v1949_v34 = vpack.c.bf16 %v1360_v28, %v1360_v28  ;;  %v2015_v1 = vpop.f32.mrb[6].mxu1 }
 0x21c   : > { %1732 = vst.msk [vmem:[%s2626_s14 + $0x58] sm:$0xf] %vm1709_vm12, %v1951_v27  ;;  %v1447_v36 = vadd.f32 %v1446_v3, %v1445_v22  ;;  %v1363_v41 = vpop.f32.mrb[7].mxu1  ;;  %v1952_v38 = vpack.c.bf16 %v2015_v1, %v2015_v1  ;;  %v1499_v42 = vmul.f32 %v2015_v1, %v2015_v1  ;;  %v1551_v44 = vsel %vm909_vm3, %v1498_v35, 0.0 }
 0x21d   : > { %v1547_v37 = vsel %vm909_vm3, %v1496_v33, 0.0  ;;  %1730 = vst.msk [vmem:[%s2626_s14 + $0x50] sm:$0xf] %vm1709_vm12, %v1949_v34  ;;  %v1448_v39 = vsel %vm909_vm3, %v1363_v41, 0.0  ;;  %v1497_v12 = vmul.f32 %v1363_v41, %v1363_v41  ;;  %v1950_v51 = vpack.c.bf16 %v1363_v41, %v1363_v41 }
 0x21e   : > { %v1548_v0 = vadd.f32 %v1547_v37, %v1546_v24  ;;  %v1449_v40 = vadd.f32 %v1448_v39, %v1447_v36  ;;  %1733 = vst.msk [vmem:[%s2626_s14 + $0x5c] sm:$0xf] %vm1709_vm12, %v1952_v38  ;;  %v1452_v45 = vsel %vm909_vm3, %v2015_v1, 0.0  ;;  %v1553_v48 = vsel %vm909_vm3, %v1499_v42, 0.0 }
 0x21f   : > { %v1549_v29 = vsel %vm909_vm3, %v1497_v12, 0.0  ;;  %1731 = vst.msk [vmem:[%s2626_s14 + $0x54] sm:$0xf] %vm1709_vm12, %v1950_v51 }
 0x220   : > { %v1451_v16 = vadd.f32 %v1450_v50, %v1449_v40  ;;  %v1550_v43 = vadd.f32 %v1549_v29, %v1548_v0 }
 0x222   : > { %v1552_v46 = vadd.f32 %v1551_v44, %v1550_v43  ;;  %v1453_v47 = vadd.f32 %v1452_v45, %v1451_v16 }
 0x224   : > { %v1554_v49 = vadd.f32 %v1553_v48, %v1552_v46 }
 0x239   : > { %v2018_v52 = vpop.f32.mrb[8].mxu1 }
 0x23a   : > { %v1955_v30 = vpack.c.bf16 %v2018_v52, %v2018_v52  ;;  %v1376_v62 = vpop.f32.mrb[9].mxu1  ;;  %v1502_v56 = vmul.f32 %v2018_v52, %v2018_v52  ;;  %v1458_v11 = vsel %vm909_vm3, %v2018_v52, 0.0 }
 0x23b   : > { %v1454_v53 = vsel %vm909_vm3, %v1376_v62, 0.0  ;;  %v1500_v25 = vmul.f32 %v1376_v62, %v1376_v62  ;;  %v1953_v54 = vpack.c.bf16 %v1376_v62, %v1376_v62  ;;  %v2019_v55 = vpop.f32.mrb[10].mxu1 }
 0x23c   : > { %1736 = vst.msk [vmem:[%s2626_s14 + $0x68] sm:$0xf] %vm1709_vm12, %v1955_v30  ;;  %v1455_v57 = vadd.f32 %v1454_v53, %v1453_v47  ;;  %v1379_v58 = vpop.f32.mrb[11].mxu1  ;;  %v1956_v60 = vpack.c.bf16 %v2019_v55, %v2019_v55  ;;  %v1503_v4 = vmul.f32 %v2019_v55, %v2019_v55  ;;  %v1559_v8 = vsel %vm909_vm3, %v1502_v56, 0.0 }
 0x23d   : > { %v1555_v59 = vsel %vm909_vm3, %v1500_v25, 0.0  ;;  %1734 = vst.msk [vmem:[%s2626_s14 + $0x60] sm:$0xf] %vm1709_vm12, %v1953_v54  ;;  %v1456_v13 = vsel %vm909_vm3, %v1379_v58, 0.0  ;;  %v1501_v61 = vmul.f32 %v1379_v58, %v1379_v58  ;;  %v1954_v2 = vpack.c.bf16 %v1379_v58, %v1379_v58 }
 0x23e   : > { %v1556_v32 = vadd.f32 %v1555_v59, %v1554_v49  ;;  %v1457_v63 = vadd.f32 %v1456_v13, %v1455_v57  ;;  %1737 = vst.msk [vmem:[%s2626_s14 + $0x6c] sm:$0xf] %vm1709_vm12, %v1956_v60  ;;  %v1460_v31 = vsel %vm909_vm3, %v2019_v55, 0.0  ;;  %v1561_v15 = vsel %vm909_vm3, %v1503_v4, 0.0 }
 0x23f   : > { %v1557_v5 = vsel %vm909_vm3, %v1501_v61, 0.0  ;;  %1735 = vst.msk [vmem:[%s2626_s14 + $0x64] sm:$0xf] %vm1709_vm12, %v1954_v2 }
 0x240   : > { %v1459_v6 = vadd.f32 %v1458_v11, %v1457_v63  ;;  %v1558_v7 = vadd.f32 %v1557_v5, %v1556_v32 }
 0x242   : > { %v1560_v9 = vadd.f32 %v1559_v8, %v1558_v7  ;;  %v1461_v10 = vadd.f32 %v1460_v31, %v1459_v6 }
 0x244   : > { %v1562_v17 = vadd.f32 %v1561_v15, %v1560_v9 }
 0x256   : > { %v2022_v14 = vpop.f32.mrb[12].mxu1 }
 0x257   : > { %v1959_v18 = vpack.c.bf16 %v2022_v14, %v2022_v14  ;;  %v1392_v19 = vpop.f32.mrb[13].mxu1  ;;  %v1506_v24 = vmul.f32 %v2022_v14, %v2022_v14  ;;  %v1466_v41 = vsel %vm909_vm3, %v2022_v14, 0.0 }
 0x258   : > { %v1462_v20 = vsel %vm909_vm3, %v1392_v19, 0.0  ;;  %v1504_v21 = vmul.f32 %v1392_v19, %v1392_v19  ;;  %v1957_v22 = vpack.c.bf16 %v1392_v19, %v1392_v19  ;;  %v2023_v23 = vpop.f32.mrb[14].mxu1 }
 0x259   : > { %1740 = vst.msk [vmem:[%s2626_s14 + $0x78] sm:$0xf] %vm1709_vm12, %v1959_v18  ;;  %v1463_v26 = vadd.f32 %v1462_v20, %v1461_v10  ;;  %v1395_v27 = vpop.f32.mrb[15].mxu1  ;;  %v1960_v3 = vpack.c.bf16 %v2023_v23, %v2023_v23  ;;  %v1507_v37 = vmul.f32 %v2023_v23, %v2023_v23  ;;  %v1567_v0 = vsel %vm909_vm3, %v1506_v24, 0.0 }
 0x25a   : > { %v1563_v28 = vsel %vm909_vm3, %v1504_v21, 0.0  ;;  %1738 = vst.msk [vmem:[%s2626_s14 + $0x70] sm:$0xf] %vm1709_vm12, %v1957_v22  ;;  %v1464_v33 = vsel %vm909_vm3, %v1395_v27, 0.0  ;;  %v1505_v34 = vmul.f32 %v1395_v27, %v1395_v27  ;;  %v1958_v36 = vpack.c.bf16 %v1395_v27, %v1395_v27 }
 0x25b   : > { %v1564_v1 = vadd.f32 %v1563_v28, %v1562_v17  ;;  %v1465_v35 = vadd.f32 %v1464_v33, %v1463_v26  ;;  %1741 = vst.msk [vmem:[%s2626_s14 + $0x7c] sm:$0xf] %vm1709_vm12, %v1960_v3  ;;  %v1468_v40 = vsel %vm909_vm3, %v2023_v23, 0.0  ;;  %v1569_v42 = vsel %vm909_vm3, %v1507_v37, 0.0 }
 0x25c   : > { %v1565_v38 = vsel %vm909_vm3, %v1505_v34, 0.0  ;;  %1739 = vst.msk [vmem:[%s2626_s14 + $0x74] sm:$0xf] %vm1709_vm12, %v1958_v36 }
 0x25d   : > { %v1467_v39 = vadd.f32 %v1466_v41, %v1465_v35  ;;  %v1566_v12 = vadd.f32 %v1565_v38, %v1564_v1 }
 0x25f   : > { %v1469_v51 = vadd.f32 %v1468_v40, %v1467_v39  ;;  %v1568_v50 = vadd.f32 %v1567_v0, %v1566_v12 }
 0x261   : > { %v1470_v29 = vrot.slane %v1469_v51, 4  ;;  %v1570_v16 = vadd.f32 %v1569_v42, %v1568_v50 }
 0x263   : > { %v1471_v43 = vadd.f32 %v1470_v29, %v1469_v51  ;;  %v1571_v44 = vrot.slane %v1570_v16, 4 }
 0x265   : > { %v1472_v45 = vrot.slane %v1471_v43, 2  ;;  %v1572_v46 = vadd.f32 %v1571_v44, %v1570_v16 }
 0x267   : > { %v1473_v47 = vadd.f32 %v1472_v45, %v1471_v43  ;;  %v1573_v48 = vrot.slane %v1572_v46, 2 }
 0x269   : > { %v1474_v49 = vrot.slane %v1473_v47, 1  ;;  %v1574_v52 = vadd.f32 %v1573_v48, %v1572_v46 }
 0x26b   : > { %v1575_v30 = vrot.slane %v1574_v52, 1  ;;  %v1475_v62 = vadd.f32 %v1474_v49, %v1473_v47 }
 0x26d   : > { %v1576_v53 = vadd.f32 %v1575_v30, %v1574_v52 }
 0x26f   : > { %v1578_v25 = vsel %vm1577_vm13, %v1475_v62, %v1576_v53 }
 0x270   : > { %1580 = vst.msk [vmem:[%s181_s18] sm:$0x3] %vm1579_vm14, %v1578_v25 }
 0x271 PF: > { %s14_s12 = sadd.s32 1, %s2100_s12  }
 0x272   : > { %p11_p4 = scmp.ge.s32.totalorder %s14_s12, 4  }
 0x274   :  { %13 = sbr.rel (!%p11_p4) target bundleno = 1 (0x1), region = 70 }

</bundles_post_ra>
